<compile_context>
chip_gen: v7x
topology: tpu7x:2x2x1
jax: 0.10.0
libtpu: 0.0.40
codegen_flags: <defaults>
</compile_context>

<pallas_src>
import functools
import math

import jax
import jax.numpy as jnp
from jax.experimental import pallas as pl
from jax.experimental.pallas import tpu as pltpu


# ---------------------------------------------------------------------------
# Generation-aware tuning (VMEM scoped limit + dense tile caps)
# ---------------------------------------------------------------------------
def _generation_tuning():
    vmem_cap = None
    try:
        vmem_cap = int(pltpu.get_tpu_info().vmem_capacity_bytes)
    except Exception:
        vmem_cap = None
    if vmem_cap is None:
        vmem_cap = 64 * 1024 * 1024            # conservative (v7x-sized) fallback
    if vmem_cap >= 96 * 1024 * 1024:           # v5e / v6e: 128 MiB VMEM per core
        return dict(vmem_limit=64 * 1024 * 1024,
                    tm_cap=512, tn_cap=1024, tk_cap=1024, tf_cap=1024)
    # v7x: 64 MiB per TensorCore -> ~0.55x capacity scoped, smaller tiles.
    return dict(vmem_limit=int(vmem_cap * 0.55),
                tm_cap=256, tn_cap=512, tk_cap=512, tf_cap=512)


_TUNE = _generation_tuning()
_VMEM_LIMIT = _TUNE["vmem_limit"]


def _gelu_tanh(x):
    # tanh-approx GELU (EUP tanh path). Matches the in-script reference.
    return 0.5 * x * (1.0 + jnp.tanh(0.7978845608028654 * (x + 0.044715 * x * x * x)))


def _pick_tile(dim, cap, align):
    """Largest tile <= cap that divides `dim` and is a multiple of `align`.
    Falls back to the full dim (always a legal block)."""
    if dim <= cap:
        return dim
    t = (cap // align) * align
    while t >= align:
        if dim % t == 0:
            return t
        t -= align
    return dim


# ---------------------------------------------------------------------------
# Tiled dense: grid (M/tm, N/tn, K/tk), f32 VMEM accumulator
# ---------------------------------------------------------------------------
def _dense_kernel(x_ref, w_ref, b_ref, o_ref, acc_ref):
    @pl.when(pl.program_id(2) == 0)
    def _():
        acc_ref[...] = jnp.zeros_like(acc_ref)

    acc_ref[...] += jnp.dot(x_ref[...], w_ref[...],
                            preferred_element_type=jnp.float32)

    @pl.when(pl.program_id(2) == pl.num_programs(2) - 1)
    def _():
        o_ref[...] = (acc_ref[...] + b_ref[...]).astype(o_ref.dtype)


def dense(x, w, b, *, out_dtype=jnp.bfloat16):
    M, K = x.shape
    N = w.shape[1]
    tm = _pick_tile(M, _TUNE["tm_cap"], 16)
    tn = _pick_tile(N, _TUNE["tn_cap"], 128)
    tk = _pick_tile(K, _TUNE["tk_cap"], 128)
    grid = (M // tm, N // tn, K // tk)
    return pl.pallas_call(
        _dense_kernel,
        out_shape=jax.ShapeDtypeStruct((M, N), out_dtype),
        grid=grid,
        in_specs=[
            pl.BlockSpec((tm, tk), lambda i, j, k: (i, k)),
            pl.BlockSpec((tk, tn), lambda i, j, k: (k, j)),
            pl.BlockSpec((1, tn), lambda i, j, k: (0, j)),
        ],
        out_specs=pl.BlockSpec((tm, tn), lambda i, j, k: (i, j)),
        scratch_shapes=[pltpu.VMEM((tm, tn), jnp.float32)],
        compiler_params=pltpu.CompilerParams(
            dimension_semantics=("parallel", "parallel", "arbitrary"),
            vmem_limit_bytes=_VMEM_LIMIT),
    )(x, w, b.reshape(1, N))


# ---------------------------------------------------------------------------
# Tiled dense with fused (bias + residual-add + LayerNorm) epilogue.
# Output width N is kept whole per block so the LN row statistics are exact.
# ---------------------------------------------------------------------------
def _dense_res_ln_kernel(x_ref, w_ref, b_ref, res_ref, g_ref, bt_ref,
                         o_ref, acc_ref, *, eps):
    @pl.when(pl.program_id(1) == 0)
    def _():
        acc_ref[...] = jnp.zeros_like(acc_ref)

    acc_ref[...] += jnp.dot(x_ref[...], w_ref[...],
                            preferred_element_type=jnp.float32)

    @pl.when(pl.program_id(1) == pl.num_programs(1) - 1)
    def _():
        y = acc_ref[...] + b_ref[...] + res_ref[...].astype(jnp.float32)
        mean = jnp.mean(y, axis=-1, keepdims=True)
        var = jnp.mean(jnp.square(y - mean), axis=-1, keepdims=True)
        o_ref[...] = ((y - mean) * jax.lax.rsqrt(var + eps)
                      * g_ref[...] + bt_ref[...]).astype(o_ref.dtype)


def dense_res_ln(x, w, b, residual, gamma, beta, *, eps=1e-12,
                 out_dtype=jnp.bfloat16):
    M, K = x.shape
    N = w.shape[1]
    tm = _pick_tile(M, _TUNE["tm_cap"], 16)
    tk = _pick_tile(K, _TUNE["tk_cap"], 128)
    grid = (M // tm, K // tk)
    return pl.pallas_call(
        functools.partial(_dense_res_ln_kernel, eps=eps),
        out_shape=jax.ShapeDtypeStruct((M, N), out_dtype),
        grid=grid,
        in_specs=[
            pl.BlockSpec((tm, tk), lambda i, k: (i, k)),
            pl.BlockSpec((tk, N), lambda i, k: (k, 0)),
            pl.BlockSpec((1, N), lambda i, k: (0, 0)),
            pl.BlockSpec((tm, N), lambda i, k: (i, 0)),
            pl.BlockSpec((1, N), lambda i, k: (0, 0)),
            pl.BlockSpec((1, N), lambda i, k: (0, 0)),
        ],
        out_specs=pl.BlockSpec((tm, N), lambda i, k: (i, 0)),
        scratch_shapes=[pltpu.VMEM((tm, N), jnp.float32)],
        compiler_params=pltpu.CompilerParams(
            dimension_semantics=("parallel", "arbitrary"),
            vmem_limit_bytes=_VMEM_LIMIT),
    )(x, w, b.reshape(1, N), residual, gamma.reshape(1, N), beta.reshape(1, N))


# ---------------------------------------------------------------------------
# Fused FFN: LN( x + (GELU(x @ wi + bi)) @ wo2 + bo2 )
# Grid iterates the F (intermediate) axis as the reduction; the (tm, tf)
# GELU tile lives only in VMEM — the (M, 4H) intermediate never hits HBM.
# ---------------------------------------------------------------------------
def _ffn_kernel(x_ref, wi_ref, bi_ref, wo2_ref, bo2_ref, res_ref, g_ref, bt_ref,
                o_ref, acc_ref, *, eps):
    @pl.when(pl.program_id(1) == 0)
    def _():
        acc_ref[...] = jnp.zeros_like(acc_ref)

    h = jnp.dot(x_ref[...], wi_ref[...], preferred_element_type=jnp.float32)
    h = _gelu_tanh(h + bi_ref[...])
    acc_ref[...] += jnp.dot(h.astype(wo2_ref.dtype), wo2_ref[...],
                            preferred_element_type=jnp.float32)

    @pl.when(pl.program_id(1) == pl.num_programs(1) - 1)
    def _():
        y = acc_ref[...] + bo2_ref[...] + res_ref[...].astype(jnp.float32)
        mean = jnp.mean(y, axis=-1, keepdims=True)
        var = jnp.mean(jnp.square(y - mean), axis=-1, keepdims=True)
        o_ref[...] = ((y - mean) * jax.lax.rsqrt(var + eps)
                      * g_ref[...] + bt_ref[...]).astype(o_ref.dtype)


def ffn_res_ln(x, wi, bi, wo2, bo2, residual, gamma, beta, *, eps=1e-12,
               out_dtype=jnp.bfloat16):
    M, H = x.shape
    F = wi.shape[1]
    tm = _pick_tile(M, _TUNE["tm_cap"], 16)
    tf = _pick_tile(F, _TUNE["tf_cap"], 128)
    grid = (M // tm, F // tf)
    return pl.pallas_call(
        functools.partial(_ffn_kernel, eps=eps),
        out_shape=jax.ShapeDtypeStruct((M, H), out_dtype),
        grid=grid,
        in_specs=[
            pl.BlockSpec((tm, H), lambda i, f: (i, 0)),   # x (resident across f)
            pl.BlockSpec((H, tf), lambda i, f: (0, f)),   # wi
            pl.BlockSpec((1, tf), lambda i, f: (0, f)),   # bi
            pl.BlockSpec((tf, H), lambda i, f: (f, 0)),   # wo2
            pl.BlockSpec((1, H), lambda i, f: (0, 0)),    # bo2
            pl.BlockSpec((tm, H), lambda i, f: (i, 0)),   # residual
            pl.BlockSpec((1, H), lambda i, f: (0, 0)),    # gamma
            pl.BlockSpec((1, H), lambda i, f: (0, 0)),    # beta
        ],
        out_specs=pl.BlockSpec((tm, H), lambda i, f: (i, 0)),
        scratch_shapes=[pltpu.VMEM((tm, H), jnp.float32)],
        compiler_params=pltpu.CompilerParams(
            dimension_semantics=("parallel", "arbitrary"),
            vmem_limit_bytes=_VMEM_LIMIT),
    )(x, wi, bi.reshape(1, F), wo2, bo2.reshape(1, H), residual,
      gamma.reshape(1, H), beta.reshape(1, H))


# ---------------------------------------------------------------------------
# Row-tiled LayerNorm (embedding LN; no residual input)
# ---------------------------------------------------------------------------
def _layernorm_kernel(x_ref, g_ref, b_ref, o_ref, *, eps):
    x = x_ref[...].astype(jnp.float32)
    mean = jnp.mean(x, axis=-1, keepdims=True)
    var = jnp.mean(jnp.square(x - mean), axis=-1, keepdims=True)
    o_ref[...] = ((x - mean) * jax.lax.rsqrt(var + eps)
                  * g_ref[...] + b_ref[...]).astype(o_ref.dtype)


def layernorm(x, gamma, beta, *, eps=1e-12, out_dtype=jnp.bfloat16):
    M, H = x.shape
    tm = _pick_tile(M, _TUNE["tm_cap"], 16)
    return pl.pallas_call(
        functools.partial(_layernorm_kernel, eps=eps),
        out_shape=jax.ShapeDtypeStruct((M, H), out_dtype),
        grid=(M // tm,),
        in_specs=[pl.BlockSpec((tm, H), lambda i: (i, 0)),
                  pl.BlockSpec((1, H), lambda i: (0, 0)),
                  pl.BlockSpec((1, H), lambda i: (0, 0))],
        out_specs=pl.BlockSpec((tm, H), lambda i: (i, 0)),
        compiler_params=pltpu.CompilerParams(
            dimension_semantics=("parallel",),
            vmem_limit_bytes=_VMEM_LIMIT),
    )(x, gamma.reshape(1, H), beta.reshape(1, H))


# ---------------------------------------------------------------------------
# Multi-head attention straight from the fused-QKV projection output.
# One batch element per grid step; q/k/v head slices are taken in-kernel so
# no XLA transpose/relayout of the hidden state is needed, and the output is
# written back lane-dense in (B*S, H) layout.  The 1/sqrt(Dh) scale is folded
# into the Q projection weights; softmax normalization is deferred to the
# (S, Dh) context (instead of the (S, S) probabilities).
# ---------------------------------------------------------------------------
def _attn_kernel(qkv_ref, m_ref, o_ref, *, num_heads, head_dim, hidden):
    qkv = qkv_ref[...]                                     # (S, 3H) bf16
    mask = m_ref[0]                                        # (1, S)  f32
    # TODO(synk): for very long sequences (S >= 1024) switch to flash-style
    # KV tiling with online softmax to bound the (S, S) score footprint.
    for h in range(num_heads):
        lo = h * head_dim
        q = qkv[:, lo:lo + head_dim]                       # (S, Dh)
        k = qkv[:, hidden + lo:hidden + lo + head_dim]
        v = qkv[:, 2 * hidden + lo:2 * hidden + lo + head_dim]
        s = jnp.dot(q, k.T, preferred_element_type=jnp.float32) + mask   # (S, S)
        s = s - jnp.max(s, axis=-1, keepdims=True)
        p = jnp.exp(s)
        l = jnp.sum(p, axis=-1, keepdims=True)             # (S, 1)
        ctx = jnp.dot(p.astype(v.dtype), v,
                      preferred_element_type=jnp.float32)  # (S, Dh)
        ctx = ctx * pl.reciprocal(l, approx=True)          # deferred softmax norm
        o_ref[:, lo:lo + head_dim] = ctx.astype(o_ref.dtype)


def attention(qkv, mask_bias, *, batch, seq, num_heads, hidden):
    M = batch * seq
    head_dim = hidden // num_heads
    return pl.pallas_call(
        functools.partial(_attn_kernel, num_heads=num_heads,
                          head_dim=head_dim, hidden=hidden),
        out_shape=jax.ShapeDtypeStruct((M, hidden), jnp.bfloat16),
        grid=(batch,),
        in_specs=[pl.BlockSpec((seq, 3 * hidden), lambda b: (b, 0)),
                  pl.BlockSpec((1, 1, seq), lambda b: (b, 0, 0))],
        out_specs=pl.BlockSpec((seq, hidden), lambda b: (b, 0)),
        compiler_params=pltpu.CompilerParams(
            dimension_semantics=("parallel",),
            vmem_limit_bytes=_VMEM_LIMIT),
    )(qkv, mask_bias)


# ---------------------------------------------------------------------------
# Full forward (Pallas kernels for the hot paths, plain JAX glue)
# ---------------------------------------------------------------------------
def forward(pp, input_ids, attention_mask, token_type_ids, cfg):
    B, S = input_ids.shape
    H = cfg["hidden"]
    nH = cfg["heads"]

    # TODO(synk): embedding lookup (data-dependent gather) kept in plain JAX.
    pos_ids = jnp.arange(S)
    emb = (jnp.take(pp["word_emb"], input_ids, axis=0)
           + jnp.take(pp["pos_emb"], pos_ids, axis=0)[None, :, :]
           + jnp.take(pp["type_emb"], token_type_ids, axis=0))
    x = layernorm(emb.reshape(B * S, H), pp["emb_ln_g"], pp["emb_ln_b"])  # bf16

    mask_bias = ((1.0 - attention_mask.astype(jnp.float32)) * -1e9).reshape(B, 1, S)

    for L in pp["layers"]:
        qkv = dense(x, L["w_qkv"], L["b_qkv"])                     # (B*S, 3H) bf16
        ctx = attention(qkv, mask_bias, batch=B, seq=S,
                        num_heads=nH, hidden=H)                    # (B*S, H) bf16
        x = dense_res_ln(ctx, L["wo"], L["bo"], x, L["ln1_g"], L["ln1_b"])
        x = ffn_res_ln(x, L["wi"], L["bi"], L["wo2"], L["bo2"],
                       x, L["ln2_g"], L["ln2_b"])

    cls = x.reshape(B, S, H)[:, 0, :].astype(jnp.float32)   # last_hidden[:, 0, :]
    # Tiny (B, num_classes) matmul: left to XLA (lane width << 128 in Pallas).
    logits = cls @ pp["cls_w"] + pp["cls_b"]
    return logits


# ---------------------------------------------------------------------------
# Pure-JAX f32 reference (same math, XLA path) for a correctness cross-check.
# ---------------------------------------------------------------------------
def forward_ref(params, input_ids, attention_mask, token_type_ids, cfg):
    B, S = input_ids.shape
    H = cfg["hidden"]
    nH = cfg["heads"]
    Dh = H // nH

    def ln(x, g, b):
        m = jnp.mean(x, -1, keepdims=True)
        v = jnp.mean(jnp.square(x - m), -1, keepdims=True)
        return (x - m) * jax.lax.rsqrt(v + 1e-12) * g + b

    pos_ids = jnp.arange(S)
    emb = (jnp.take(params["word_emb"], input_ids, axis=0)
           + jnp.take(params["pos_emb"], pos_ids, axis=0)[None]
           + jnp.take(params["type_emb"], token_type_ids, axis=0))
    x = ln(emb.reshape(B * S, H), params["emb_ln_g"], params["emb_ln_b"])
    bias = ((1.0 - attention_mask.astype(jnp.float32)) * -1e9)[:, None, None, :]

    for layer in params["layers"]:
        q = (x @ layer["wq"] + layer["bq"]).reshape(B, S, nH, Dh).transpose(0, 2, 1, 3)
        k = (x @ layer["wk"] + layer["bk"]).reshape(B, S, nH, Dh).transpose(0, 2, 1, 3)
        v = (x @ layer["wv"] + layer["bv"]).reshape(B, S, nH, Dh).transpose(0, 2, 1, 3)
        s = jnp.einsum("bhqd,bhkd->bhqk", q, k) / math.sqrt(Dh) + bias
        p = jax.nn.softmax(s, axis=-1)
        ctx = jnp.einsum("bhqk,bhkd->bhqd", p, v).transpose(0, 2, 1, 3).reshape(B * S, H)
        x = ln(ctx @ layer["wo"] + layer["bo"] + x, layer["ln1_g"], layer["ln1_b"])
        h = _gelu_tanh(x @ layer["wi"] + layer["bi"])
        x = ln(h @ layer["wo2"] + layer["bo2"] + x, layer["ln2_g"], layer["ln2_b"])

    cls = x.reshape(B, S, H)[:, 0, :]
    return cls @ params["cls_w"] + params["cls_b"]


# ---------------------------------------------------------------------------
# Deterministic parameter init + Pallas-side param prep
# (fused QKV, 1/sqrt(Dh) folded into Q, matmul weights cast to bf16)
# ---------------------------------------------------------------------------
def init_params(key, cfg):
    H, F, C = cfg["hidden"], cfg["ffn"], cfg["num_classes"]
    kit = iter(jax.random.split(key, 64))

    def w(shape):
        return (0.02 * jax.random.normal(next(kit), shape)).astype(jnp.float32)

    params = {
        "word_emb": w((cfg["vocab"], H)),
        "pos_emb": w((cfg["max_pos"], H)),
        "type_emb": w((cfg["type_vocab"], H)),
        "emb_ln_g": jnp.ones((H,), jnp.float32),
        "emb_ln_b": jnp.zeros((H,), jnp.float32),
        "layers": [],
        "cls_w": w((H, C)),
        "cls_b": jnp.zeros((C,), jnp.float32),
    }
    for _ in range(cfg["layers"]):
        params["layers"].append({
            "wq": w((H, H)), "bq": jnp.zeros((H,), jnp.float32),
            "wk": w((H, H)), "bk": jnp.zeros((H,), jnp.float32),
            "wv": w((H, H)), "bv": jnp.zeros((H,), jnp.float32),
            "wo": w((H, H)), "bo": jnp.zeros((H,), jnp.float32),
            "ln1_g": jnp.ones((H,), jnp.float32), "ln1_b": jnp.zeros((H,), jnp.float32),
            "wi": w((H, F)), "bi": jnp.zeros((F,), jnp.float32),
            "wo2": w((F, H)), "bo2": jnp.zeros((H,), jnp.float32),
            "ln2_g": jnp.ones((H,), jnp.float32), "ln2_b": jnp.zeros((H,), jnp.float32),
        })
    return params


def prep_params(params, cfg):
    """Fuse Wq/Wk/Wv (with 1/sqrt(Dh) folded into Q) and cast matmul weights
    to bf16 for the Pallas path."""
    Dh = cfg["hidden"] // cfg["heads"]
    q_scale = 1.0 / math.sqrt(Dh)
    pp = {
        "word_emb": params["word_emb"],
        "pos_emb": params["pos_emb"],
        "type_emb": params["type_emb"],
        "emb_ln_g": params["emb_ln_g"], "emb_ln_b": params["emb_ln_b"],
        "cls_w": params["cls_w"], "cls_b": params["cls_b"],
        "layers": [],
    }
    for L in params["layers"]:
        pp["layers"].append({
            "w_qkv": jnp.concatenate(
                [L["wq"] * q_scale, L["wk"], L["wv"]], axis=1).astype(jnp.bfloat16),
            "b_qkv": jnp.concatenate([L["bq"] * q_scale, L["bk"], L["bv"]]),
            "wo": L["wo"].astype(jnp.bfloat16), "bo": L["bo"],
            "ln1_g": L["ln1_g"], "ln1_b": L["ln1_b"],
            "wi": L["wi"].astype(jnp.bfloat16), "bi": L["bi"],
            "wo2": L["wo2"].astype(jnp.bfloat16), "bo2": L["bo2"],
            "ln2_g": L["ln2_g"], "ln2_b": L["ln2_b"],
        })
    return pp


if __name__ == "__main__":
    cfg = dict(vocab=50, hidden=32, heads=4, ffn=64, layers=2,
               max_pos=16, type_vocab=2, num_classes=5)
    key = jax.random.PRNGKey(0)
    pkey, ikey = jax.random.split(key)
    params = init_params(pkey, cfg)
    pp = prep_params(params, cfg)

    B, S = 2, 8
    input_ids = jax.random.randint(ikey, (B, S), 0, cfg["vocab"], dtype=jnp.int32)
    attention_mask = jnp.array([[1, 1, 1, 1, 1, 1, 1, 1],
                                [1, 1, 1, 1, 1, 1, 0, 0]], dtype=jnp.int32)
    token_type_ids = jnp.zeros((B, S), dtype=jnp.int32)

    fwd = jax.jit(functools.partial(forward, cfg=cfg))
    logits = fwd(pp, input_ids, attention_mask, token_type_ids)
    logits = jax.block_until_ready(logits)

    ref = forward_ref(params, input_ids, attention_mask, token_type_ids, cfg)
    assert logits.shape == (B, cfg["num_classes"]), logits.shape
    # bf16 matmul operands + approx softmax reciprocal -> loosened tolerance.
    assert jnp.allclose(logits, ref, atol=5e-2, rtol=5e-2), \
        f"max abs diff {jnp.max(jnp.abs(logits - ref))}"

    print("KERNEL_OK")
</pallas_src>

<mosaic_0001>
module attributes {stable_mosaic.version = 11 : i64} {
  func.func @_dense_kernel(%arg0: i32, %arg1: i32, %arg2: i32, %arg3: memref<16x32xbf16, #tpu.memory_space<vmem>>, %arg4: memref<32x96xbf16, #tpu.memory_space<vmem>>, %arg5: memref<1x96xf32, #tpu.memory_space<vmem>>, %arg6: memref<16x96xbf16, #tpu.memory_space<vmem>>, %arg7: memref<16x96xf32, #tpu.memory_space<vmem>>) attributes {dimension_semantics = [#tpu.dimension_semantics<parallel>, #tpu.dimension_semantics<parallel>, #tpu.dimension_semantics<arbitrary>], iteration_bounds = array<i64: 1, 1, 1>, scalar_prefetch = 0 : i64, scratch_operands = 1 : i64, tpu.core_type = #tpu.core_type<tc>, window_params = [{transform_indices = @transform_0, window_bounds = array<i64: 16, 32>}, {transform_indices = @transform_1, window_bounds = array<i64: 32, 96>}, {transform_indices = @transform_2, window_bounds = array<i64: 1, 96>}, {transform_indices = @transform_3, window_bounds = array<i64: 16, 96>}]} {
    %c0_i32 = arith.constant 0 : i32
    %0 = arith.cmpi eq, %arg2, %c0_i32 : i32
    %1 = arith.extui %0 : i1 to i32
    %c0_i32_0 = arith.constant 0 : i32
    %2 = arith.cmpi ne, %1, %c0_i32_0 : i32
    scf.if %2 {
      %cst_10 = arith.constant 0.000000e+00 : f32
      %12 = vector.broadcast %cst_10 : f32 to vector<16x96xf32>
      %c0_11 = arith.constant 0 : index
      %c0_12 = arith.constant 0 : index
      %13 = vector.load %arg7[%c0_11, %c0_12] : memref<16x96xf32, #tpu.memory_space<vmem>>, vector<16x96xf32>
      tpu.vector_store %arg7[%c0_11, %c0_12], %12 {strides = array<i32>} : memref<16x96xf32, #tpu.memory_space<vmem>>, vector<16x96xf32>,
    } else {
    }
    %c0 = arith.constant 0 : index
    %c0_1 = arith.constant 0 : index
    %3 = vector.load %arg7[%c0, %c0_1] : memref<16x96xf32, #tpu.memory_space<vmem>>, vector<16x96xf32>
    %c0_2 = arith.constant 0 : index
    %c0_3 = arith.constant 0 : index
    %4 = vector.load %arg3[%c0_2, %c0_3] : memref<16x32xbf16, #tpu.memory_space<vmem>>, vector<16x32xbf16>
    %c0_4 = arith.constant 0 : index
    %c0_5 = arith.constant 0 : index
    %5 = vector.load %arg4[%c0_4, %c0_5] : memref<32x96xbf16, #tpu.memory_space<vmem>>, vector<32x96xbf16>
    %cst = arith.constant dense<0.000000e+00> : vector<16x96xf32>
    %6 = tpu.matmul %4, %5, %cst {dimension_numbers = #tpu.dot_dimension_numbers<[1], [0], [0], [1], [0, 0, 1, 1], [], []>} : vector<16x32xbf16>, vector<32x96xbf16>, vector<16x96xf32> -> vector<16x96xf32>
    %7 = arith.addf %3, %6 : vector<16x96xf32>
    %c0_6 = arith.constant 0 : index
    %c0_7 = arith.constant 0 : index
    %8 = vector.load %arg7[%c0_6, %c0_7] : memref<16x96xf32, #tpu.memory_space<vmem>>, vector<16x96xf32>
    tpu.vector_store %arg7[%c0_6, %c0_7], %7 {strides = array<i32>} : memref<16x96xf32, #tpu.memory_space<vmem>>, vector<16x96xf32>,
    %c0_i32_8 = arith.constant 0 : i32
    %9 = arith.cmpi eq, %arg2, %c0_i32_8 : i32
    %10 = arith.extui %9 : i1 to i32
    %c0_i32_9 = arith.constant 0 : i32
    %11 = arith.cmpi ne, %10, %c0_i32_9 : i32
    scf.if %11 {
      %c0_10 = arith.constant 0 : index
      %c0_11 = arith.constant 0 : index
      %12 = vector.load %arg7[%c0_10, %c0_11] : memref<16x96xf32, #tpu.memory_space<vmem>>, vector<16x96xf32>
      %c0_12 = arith.constant 0 : index
      %c0_13 = arith.constant 0 : index
      %13 = vector.load %arg5[%c0_12, %c0_13] : memref<1x96xf32, #tpu.memory_space<vmem>>, vector<1x96xf32>
      %14 = vector.broadcast %13 : vector<1x96xf32> to vector<16x96xf32>
      %15 = arith.addf %12, %14 : vector<16x96xf32>
      %16 = arith.truncf %15 : vector<16x96xf32> to vector<16x96xbf16>
      %c0_14 = arith.constant 0 : index
      %c0_15 = arith.constant 0 : index
      %17 = vector.load %arg6[%c0_14, %c0_15] : memref<16x96xbf16, #tpu.memory_space<vmem>>, vector<16x96xbf16>
      tpu.vector_store %arg6[%c0_14, %c0_15], %16 {strides = array<i32>} : memref<16x96xbf16, #tpu.memory_space<vmem>>, vector<16x96xbf16>,
    } else {
    }
    return
  }
  func.func @transform_0(%arg0: i32, %arg1: i32, %arg2: i32) -> (i32, i32) {
    %c0_i32 = arith.constant 0 : i32
    return %arg0, %arg2 : i32, i32
  }
  func.func @transform_1(%arg0: i32, %arg1: i32, %arg2: i32) -> (i32, i32) {
    %c0_i32 = arith.constant 0 : i32
    return %arg2, %arg1 : i32, i32
  }
  func.func @transform_2(%arg0: i32, %arg1: i32, %arg2: i32) -> (i32, i32) {
    %c0_i32 = arith.constant 0 : i32
    %c0_i32_0 = arith.constant 0 : i32
    return %c0_i32, %arg1 : i32, i32
  }
  func.func @transform_3(%arg0: i32, %arg1: i32, %arg2: i32) -> (i32, i32) {
    %c0_i32 = arith.constant 0 : i32
    return %arg0, %arg1 : i32, i32
  }
}

module attributes {stable_mosaic.version = 11 : i64} {
  func.func @_dense_res_ln_kernel(%arg0: i32, %arg1: i32, %arg2: memref<16x32xbf16, #tpu.memory_space<vmem>>, %arg3: memref<32x32xbf16, #tpu.memory_space<vmem>>, %arg4: memref<1x32xf32, #tpu.memory_space<vmem>>, %arg5: memref<16x32xbf16, #tpu.memory_space<vmem>>, %arg6: memref<1x32xf32, #tpu.memory_space<vmem>>, %arg7: memref<1x32xf32, #tpu.memory_space<vmem>>, %arg8: memref<16x32xbf16, #tpu.memory_space<vmem>>, %arg9: memref<16x32xf32, #tpu.memory_space<vmem>>) attributes {dimension_semantics = [#tpu.dimension_semantics<parallel>, #tpu.dimension_semantics<arbitrary>], iteration_bounds = array<i64: 1, 1>, scalar_prefetch = 0 : i64, scratch_operands = 1 : i64, tpu.core_type = #tpu.core_type<tc>, window_params = [{transform_indices = @transform_0, window_bounds = array<i64: 16, 32>}, {transform_indices = @transform_1, window_bounds = array<i64: 32, 32>}, {pipeline_mode = #tpu.pipeline_mode<synchronous>, transform_indices = @transform_2, window_bounds = array<i64: 1, 32>}, {transform_indices = @transform_3, window_bounds = array<i64: 16, 32>}, {pipeline_mode = #tpu.pipeline_mode<synchronous>, transform_indices = @transform_4, window_bounds = array<i64: 1, 32>}, {pipeline_mode = #tpu.pipeline_mode<synchronous>, transform_indices = @transform_5, window_bounds = array<i64: 1, 32>}, {transform_indices = @transform_6, window_bounds = array<i64: 16, 32>}]} {
    %c0_i32 = arith.constant 0 : i32
    %0 = arith.cmpi eq, %arg1, %c0_i32 : i32
    %1 = arith.extui %0 : i1 to i32
    %c0_i32_0 = arith.constant 0 : i32
    %2 = arith.cmpi ne, %1, %c0_i32_0 : i32
    scf.if %2 {
      %cst_10 = arith.constant 0.000000e+00 : f32
      %12 = vector.broadcast %cst_10 : f32 to vector<16x32xf32>
      %c0_11 = arith.constant 0 : index
      %c0_12 = arith.constant 0 : index
      %13 = vector.load %arg9[%c0_11, %c0_12] : memref<16x32xf32, #tpu.memory_space<vmem>>, vector<16x32xf32>
      tpu.vector_store %arg9[%c0_11, %c0_12], %12 {strides = array<i32>} : memref<16x32xf32, #tpu.memory_space<vmem>>, vector<16x32xf32>,
    } else {
    }
    %c0 = arith.constant 0 : index
    %c0_1 = arith.constant 0 : index
    %3 = vector.load %arg9[%c0, %c0_1] : memref<16x32xf32, #tpu.memory_space<vmem>>, vector<16x32xf32>
    %c0_2 = arith.constant 0 : index
    %c0_3 = arith.constant 0 : index
    %4 = vector.load %arg2[%c0_2, %c0_3] : memref<16x32xbf16, #tpu.memory_space<vmem>>, vector<16x32xbf16>
    %c0_4 = arith.constant 0 : index
    %c0_5 = arith.constant 0 : index
    %5 = vector.load %arg3[%c0_4, %c0_5] : memref<32x32xbf16, #tpu.memory_space<vmem>>, vector<32x32xbf16>
    %cst = arith.constant dense<0.000000e+00> : vector<16x32xf32>
    %6 = tpu.matmul %4, %5, %cst {dimension_numbers = #tpu.dot_dimension_numbers<[1], [0], [0], [1], [0, 0, 1, 1], [], []>} : vector<16x32xbf16>, vector<32x32xbf16>, vector<16x32xf32> -> vector<16x32xf32>
    %7 = arith.addf %3, %6 : vector<16x32xf32>
    %c0_6 = arith.constant 0 : index
    %c0_7 = arith.constant 0 : index
    %8 = vector.load %arg9[%c0_6, %c0_7] : memref<16x32xf32, #tpu.memory_space<vmem>>, vector<16x32xf32>
    tpu.vector_store %arg9[%c0_6, %c0_7], %7 {strides = array<i32>} : memref<16x32xf32, #tpu.memory_space<vmem>>, vector<16x32xf32>,
    %c0_i32_8 = arith.constant 0 : i32
    %9 = arith.cmpi eq, %arg1, %c0_i32_8 : i32
    %10 = arith.extui %9 : i1 to i32
    %c0_i32_9 = arith.constant 0 : i32
    %11 = arith.cmpi ne, %10, %c0_i32_9 : i32
    scf.if %11 {
      %c0_10 = arith.constant 0 : index
      %c0_11 = arith.constant 0 : index
      %12 = vector.load %arg9[%c0_10, %c0_11] : memref<16x32xf32, #tpu.memory_space<vmem>>, vector<16x32xf32>
      %c0_12 = arith.constant 0 : index
      %c0_13 = arith.constant 0 : index
      %13 = vector.load %arg4[%c0_12, %c0_13] : memref<1x32xf32, #tpu.memory_space<vmem>>, vector<1x32xf32>
      %14 = vector.broadcast %13 : vector<1x32xf32> to vector<16x32xf32>
      %15 = arith.addf %12, %14 : vector<16x32xf32>
      %c0_14 = arith.constant 0 : index
      %c0_15 = arith.constant 0 : index
      %16 = vector.load %arg5[%c0_14, %c0_15] : memref<16x32xbf16, #tpu.memory_space<vmem>>, vector<16x32xbf16>
      %17 = arith.extf %16 : vector<16x32xbf16> to vector<16x32xf32>
      %18 = arith.addf %15, %17 : vector<16x32xf32>
      %cst_16 = arith.constant dense<0.000000e+00> : vector<16xf32>
      %19 = vector.multi_reduction <add>, %18, %cst_16 [1] : vector<16x32xf32> to vector<16xf32>
      %20 = vector.shape_cast %19 : vector<16xf32> to vector<16x1xf32>
      %cst_17 = arith.constant 3.200000e+01 : f32
      %21 = vector.broadcast %cst_17 : f32 to vector<16x1xf32>
      %22 = arith.divf %20, %21 : vector<16x1xf32>
      %23 = vector.broadcast %22 : vector<16x1xf32> to vector<16x32xf32>
      %24 = arith.subf %18, %23 : vector<16x32xf32>
      %25 = arith.mulf %24, %24 : vector<16x32xf32>
      %cst_18 = arith.constant dense<0.000000e+00> : vector<16xf32>
      %26 = vector.multi_reduction <add>, %25, %cst_18 [1] : vector<16x32xf32> to vector<16xf32>
      %27 = vector.shape_cast %26 : vector<16xf32> to vector<16x1xf32>
      %cst_19 = arith.constant 3.200000e+01 : f32
      %28 = vector.broadcast %cst_19 : f32 to vector<16x1xf32>
      %29 = arith.divf %27, %28 : vector<16x1xf32>
      %30 = vector.broadcast %22 : vector<16x1xf32> to vector<16x32xf32>
      %31 = arith.subf %18, %30 : vector<16x32xf32>
      %cst_20 = arith.constant 9.99999996E-13 : f32
      %32 = vector.broadcast %cst_20 : f32 to vector<16x1xf32>
      %33 = arith.addf %29, %32 : vector<16x1xf32>
      %34 = math.rsqrt %33 : vector<16x1xf32>
      %35 = vector.broadcast %34 : vector<16x1xf32> to vector<16x32xf32>
      %36 = arith.mulf %31, %35 : vector<16x32xf32>
      %c0_21 = arith.constant 0 : index
      %c0_22 = arith.constant 0 : index
      %37 = vector.load %arg6[%c0_21, %c0_22] : memref<1x32xf32, #tpu.memory_space<vmem>>, vector<1x32xf32>
      %38 = vector.broadcast %37 : vector<1x32xf32> to vector<16x32xf32>
      %39 = arith.mulf %36, %38 : vector<16x32xf32>
      %c0_23 = arith.constant 0 : index
      %c0_24 = arith.constant 0 : index
      %40 = vector.load %arg7[%c0_23, %c0_24] : memref<1x32xf32, #tpu.memory_space<vmem>>, vector<1x32xf32>
      %41 = vector.broadcast %40 : vector<1x32xf32> to vector<16x32xf32>
      %42 = arith.addf %39, %41 : vector<16x32xf32>
      %43 = arith.truncf %42 : vector<16x32xf32> to vector<16x32xbf16>
      %c0_25 = arith.constant 0 : index
      %c0_26 = arith.constant 0 : index
      %44 = vector.load %arg8[%c0_25, %c0_26] : memref<16x32xbf16, #tpu.memory_space<vmem>>, vector<16x32xbf16>
      tpu.vector_store %arg8[%c0_25, %c0_26], %43 {strides = array<i32>} : memref<16x32xbf16, #tpu.memory_space<vmem>>, vector<16x32xbf16>,
    } else {
    }
    return
  }
  func.func @transform_0(%arg0: i32, %arg1: i32) -> (i32, i32) {
    %c0_i32 = arith.constant 0 : i32
    return %arg0, %arg1 : i32, i32
  }
  func.func @transform_1(%arg0: i32, %arg1: i32) -> (i32, i32) {
    %c0_i32 = arith.constant 0 : i32
    %c0_i32_0 = arith.constant 0 : i32
    return %arg1, %c0_i32 : i32, i32
  }
  func.func @transform_2(%arg0: i32, %arg1: i32) -> (i32, i32) {
    %c0_i32 = arith.constant 0 : i32
    %c0_i32_0 = arith.constant 0 : i32
    %c0_i32_1 = arith.constant 0 : i32
    return %c0_i32, %c0_i32_0 : i32, i32
  }
  func.func @transform_3(%arg0: i32, %arg1: i32) -> (i32, i32) {
    %c0_i32 = arith.constant 0 : i32
    %c0_i32_0 = arith.constant 0 : i32
    return %arg0, %c0_i32 : i32, i32
  }
  func.func @transform_4(%arg0: i32, %arg1: i32) -> (i32, i32) {
    %c0_i32 = arith.constant 0 : i32
    %c0_i32_0 = arith.constant 0 : i32
    %c0_i32_1 = arith.constant 0 : i32
    return %c0_i32, %c0_i32_0 : i32, i32
  }
  func.func @transform_5(%arg0: i32, %arg1: i32) -> (i32, i32) {
    %c0_i32 = arith.constant 0 : i32
    %c0_i32_0 = arith.constant 0 : i32
    %c0_i32_1 = arith.constant 0 : i32
    return %c0_i32, %c0_i32_0 : i32, i32
  }
  func.func @transform_6(%arg0: i32, %arg1: i32) -> (i32, i32) {
    %c0_i32 = arith.constant 0 : i32
    %c0_i32_0 = arith.constant 0 : i32
    return %arg0, %c0_i32 : i32, i32
  }
}

module attributes {stable_mosaic.version = 11 : i64} {
  func.func @_layernorm_kernel(%arg0: i32, %arg1: memref<16x32xf32, #tpu.memory_space<vmem>>, %arg2: memref<1x32xf32, #tpu.memory_space<vmem>>, %arg3: memref<1x32xf32, #tpu.memory_space<vmem>>, %arg4: memref<16x32xbf16, #tpu.memory_space<vmem>>) attributes {dimension_semantics = [#tpu.dimension_semantics<parallel>], iteration_bounds = array<i64: 1>, scalar_prefetch = 0 : i64, scratch_operands = 0 : i64, tpu.core_type = #tpu.core_type<tc>, window_params = [{transform_indices = @transform_0, window_bounds = array<i64: 16, 32>}, {pipeline_mode = #tpu.pipeline_mode<synchronous>, transform_indices = @transform_1, window_bounds = array<i64: 1, 32>}, {pipeline_mode = #tpu.pipeline_mode<synchronous>, transform_indices = @transform_2, window_bounds = array<i64: 1, 32>}, {transform_indices = @transform_3, window_bounds = array<i64: 16, 32>}]} {
    %c0 = arith.constant 0 : index
    %c0_0 = arith.constant 0 : index
    %0 = vector.load %arg1[%c0, %c0_0] : memref<16x32xf32, #tpu.memory_space<vmem>>, vector<16x32xf32>
    %cst = arith.constant dense<0.000000e+00> : vector<16xf32>
    %1 = vector.multi_reduction <add>, %0, %cst [1] : vector<16x32xf32> to vector<16xf32>
    %2 = vector.shape_cast %1 : vector<16xf32> to vector<16x1xf32>
    %cst_1 = arith.constant 3.200000e+01 : f32
    %3 = vector.broadcast %cst_1 : f32 to vector<16x1xf32>
    %4 = arith.divf %2, %3 : vector<16x1xf32>
    %5 = vector.broadcast %4 : vector<16x1xf32> to vector<16x32xf32>
    %6 = arith.subf %0, %5 : vector<16x32xf32>
    %7 = arith.mulf %6, %6 : vector<16x32xf32>
    %cst_2 = arith.constant dense<0.000000e+00> : vector<16xf32>
    %8 = vector.multi_reduction <add>, %7, %cst_2 [1] : vector<16x32xf32> to vector<16xf32>
    %9 = vector.shape_cast %8 : vector<16xf32> to vector<16x1xf32>
    %cst_3 = arith.constant 3.200000e+01 : f32
    %10 = vector.broadcast %cst_3 : f32 to vector<16x1xf32>
    %11 = arith.divf %9, %10 : vector<16x1xf32>
    %12 = vector.broadcast %4 : vector<16x1xf32> to vector<16x32xf32>
    %13 = arith.subf %0, %12 : vector<16x32xf32>
    %cst_4 = arith.constant 9.99999996E-13 : f32
    %14 = vector.broadcast %cst_4 : f32 to vector<16x1xf32>
    %15 = arith.addf %11, %14 : vector<16x1xf32>
    %16 = math.rsqrt %15 : vector<16x1xf32>
    %17 = vector.broadcast %16 : vector<16x1xf32> to vector<16x32xf32>
    %18 = arith.mulf %13, %17 : vector<16x32xf32>
    %c0_5 = arith.constant 0 : index
    %c0_6 = arith.constant 0 : index
    %19 = vector.load %arg2[%c0_5, %c0_6] : memref<1x32xf32, #tpu.memory_space<vmem>>, vector<1x32xf32>
    %20 = vector.broadcast %19 : vector<1x32xf32> to vector<16x32xf32>
    %21 = arith.mulf %18, %20 : vector<16x32xf32>
    %c0_7 = arith.constant 0 : index
    %c0_8 = arith.constant 0 : index
    %22 = vector.load %arg3[%c0_7, %c0_8] : memref<1x32xf32, #tpu.memory_space<vmem>>, vector<1x32xf32>
    %23 = vector.broadcast %22 : vector<1x32xf32> to vector<16x32xf32>
    %24 = arith.addf %21, %23 : vector<16x32xf32>
    %25 = arith.truncf %24 : vector<16x32xf32> to vector<16x32xbf16>
    %c0_9 = arith.constant 0 : index
    %c0_10 = arith.constant 0 : index
    %26 = vector.load %arg4[%c0_9, %c0_10] : memref<16x32xbf16, #tpu.memory_space<vmem>>, vector<16x32xbf16>
    tpu.vector_store %arg4[%c0_9, %c0_10], %25 {strides = array<i32>} : memref<16x32xbf16, #tpu.memory_space<vmem>>, vector<16x32xbf16>,
    return
  }
  func.func @transform_0(%arg0: i32) -> (i32, i32) {
    %c0_i32 = arith.constant 0 : i32
    %c0_i32_0 = arith.constant 0 : i32
    return %arg0, %c0_i32 : i32, i32
  }
  func.func @transform_1(%arg0: i32) -> (i32, i32) {
    %c0_i32 = arith.constant 0 : i32
    %c0_i32_0 = arith.constant 0 : i32
    %c0_i32_1 = arith.constant 0 : i32
    return %c0_i32, %c0_i32_0 : i32, i32
  }
  func.func @transform_2(%arg0: i32) -> (i32, i32) {
    %c0_i32 = arith.constant 0 : i32
    %c0_i32_0 = arith.constant 0 : i32
    %c0_i32_1 = arith.constant 0 : i32
    return %c0_i32, %c0_i32_0 : i32, i32
  }
  func.func @transform_3(%arg0: i32) -> (i32, i32) {
    %c0_i32 = arith.constant 0 : i32
    %c0_i32_0 = arith.constant 0 : i32
    return %arg0, %c0_i32 : i32, i32
  }
}

module attributes {stable_mosaic.version = 11 : i64} {
  func.func @_attn_kernel(%arg0: i32, %arg1: memref<8x96xbf16, #tpu.memory_space<vmem>>, %arg2: memref<1x1x8xf32, #tpu.memory_space<vmem>>, %arg3: memref<8x32xbf16, #tpu.memory_space<vmem>>) attributes {dimension_semantics = [#tpu.dimension_semantics<parallel>], iteration_bounds = array<i64: 2>, scalar_prefetch = 0 : i64, scratch_operands = 0 : i64, tpu.core_type = #tpu.core_type<tc>, window_params = [{transform_indices = @transform_0, window_bounds = array<i64: 8, 96>}, {transform_indices = @transform_1, window_bounds = array<i64: 1, 1, 8>}, {transform_indices = @transform_2, window_bounds = array<i64: 8, 32>}]} {
    %c0 = arith.constant 0 : index
    %c0_0 = arith.constant 0 : index
    %0 = vector.load %arg1[%c0, %c0_0] : memref<8x96xbf16, #tpu.memory_space<vmem>>, vector<8x96xbf16>
    %c0_1 = arith.constant 0 : index
    %c0_2 = arith.constant 0 : index
    %c0_3 = arith.constant 0 : index
    %1 = vector.load %arg2[%c0_1, %c0_2, %c0_3] : memref<1x1x8xf32, #tpu.memory_space<vmem>>, vector<1x1x8xf32>
    %2 = vector.shape_cast %1 : vector<1x1x8xf32> to vector<1x8xf32>
    %3 = vector.extract_strided_slice %0 {offsets = [0, 0], sizes = [8, 8], strides = [1, 1]} : vector<8x96xbf16> to vector<8x8xbf16>
    %4 = vector.extract_strided_slice %0 {offsets = [0, 32], sizes = [8, 8], strides = [1, 1]} : vector<8x96xbf16> to vector<8x8xbf16>
    %5 = vector.extract_strided_slice %0 {offsets = [0, 64], sizes = [8, 8], strides = [1, 1]} : vector<8x96xbf16> to vector<8x8xbf16>
    %6 = tpu.transpose %4, [1, 0] : vector<8x8xbf16> -> vector<8x8xbf16>
    %cst = arith.constant dense<0.000000e+00> : vector<8x8xf32>
    %7 = tpu.matmul %3, %6, %cst {dimension_numbers = #tpu.dot_dimension_numbers<[1], [0], [0], [1], [0, 0, 1, 1], [], []>} : vector<8x8xbf16>, vector<8x8xbf16>, vector<8x8xf32> -> vector<8x8xf32>
    %8 = vector.broadcast %2 : vector<1x8xf32> to vector<8x8xf32>
    %9 = arith.addf %7, %8 : vector<8x8xf32>
    %cst_4 = arith.constant dense<0xFF800000> : vector<8xf32>
    %10 = vector.multi_reduction <maximumf>, %9, %cst_4 [1] : vector<8x8xf32> to vector<8xf32>
    %11 = vector.shape_cast %10 : vector<8xf32> to vector<8x1xf32>
    %12 = vector.broadcast %11 : vector<8x1xf32> to vector<8x8xf32>
    %13 = arith.subf %9, %12 : vector<8x8xf32>
    %14 = math.exp %13 : vector<8x8xf32>
    %cst_5 = arith.constant dense<0.000000e+00> : vector<8xf32>
    %15 = vector.multi_reduction <add>, %14, %cst_5 [1] : vector<8x8xf32> to vector<8xf32>
    %16 = vector.shape_cast %15 : vector<8xf32> to vector<8x1xf32>
    %17 = arith.truncf %14 : vector<8x8xf32> to vector<8x8xbf16>
    %cst_6 = arith.constant dense<0.000000e+00> : vector<8x8xf32>
    %18 = tpu.matmul %17, %5, %cst_6 {dimension_numbers = #tpu.dot_dimension_numbers<[1], [0], [0], [1], [0, 0, 1, 1], [], []>} : vector<8x8xbf16>, vector<8x8xbf16>, vector<8x8xf32> -> vector<8x8xf32>
    %19 = tpu.reciprocal %16 {approx = true} : vector<8x1xf32> -> vector<8x1xf32>
    %20 = vector.broadcast %19 : vector<8x1xf32> to vector<8x8xf32>
    %21 = arith.mulf %18, %20 : vector<8x8xf32>
    %22 = arith.truncf %21 : vector<8x8xf32> to vector<8x8xbf16>
    %c0_7 = arith.constant 0 : index
    %c0_8 = arith.constant 0 : index
    %23 = vector.load %arg3[%c0_7, %c0_8] : memref<8x32xbf16, #tpu.memory_space<vmem>>, vector<8x8xbf16>
    tpu.vector_store %arg3[%c0_7, %c0_8], %22 {strides = array<i32>} : memref<8x32xbf16, #tpu.memory_space<vmem>>, vector<8x8xbf16>,
    %24 = vector.extract_strided_slice %0 {offsets = [0, 8], sizes = [8, 8], strides = [1, 1]} : vector<8x96xbf16> to vector<8x8xbf16>
    %25 = vector.extract_strided_slice %0 {offsets = [0, 40], sizes = [8, 8], strides = [1, 1]} : vector<8x96xbf16> to vector<8x8xbf16>
    %26 = vector.extract_strided_slice %0 {offsets = [0, 72], sizes = [8, 8], strides = [1, 1]} : vector<8x96xbf16> to vector<8x8xbf16>
    %27 = tpu.transpose %25, [1, 0] : vector<8x8xbf16> -> vector<8x8xbf16>
    %cst_9 = arith.constant dense<0.000000e+00> : vector<8x8xf32>
    %28 = tpu.matmul %24, %27, %cst_9 {dimension_numbers = #tpu.dot_dimension_numbers<[1], [0], [0], [1], [0, 0, 1, 1], [], []>} : vector<8x8xbf16>, vector<8x8xbf16>, vector<8x8xf32> -> vector<8x8xf32>
    %29 = vector.broadcast %2 : vector<1x8xf32> to vector<8x8xf32>
    %30 = arith.addf %28, %29 : vector<8x8xf32>
    %cst_10 = arith.constant dense<0xFF800000> : vector<8xf32>
    %31 = vector.multi_reduction <maximumf>, %30, %cst_10 [1] : vector<8x8xf32> to vector<8xf32>
    %32 = vector.shape_cast %31 : vector<8xf32> to vector<8x1xf32>
    %33 = vector.broadcast %32 : vector<8x1xf32> to vector<8x8xf32>
    %34 = arith.subf %30, %33 : vector<8x8xf32>
    %35 = math.exp %34 : vector<8x8xf32>
    %cst_11 = arith.constant dense<0.000000e+00> : vector<8xf32>
    %36 = vector.multi_reduction <add>, %35, %cst_11 [1] : vector<8x8xf32> to vector<8xf32>
    %37 = vector.shape_cast %36 : vector<8xf32> to vector<8x1xf32>
    %38 = arith.truncf %35 : vector<8x8xf32> to vector<8x8xbf16>
    %cst_12 = arith.constant dense<0.000000e+00> : vector<8x8xf32>
    %39 = tpu.matmul %38, %26, %cst_12 {dimension_numbers = #tpu.dot_dimension_numbers<[1], [0], [0], [1], [0, 0, 1, 1], [], []>} : vector<8x8xbf16>, vector<8x8xbf16>, vector<8x8xf32> -> vector<8x8xf32>
    %40 = tpu.reciprocal %37 {approx = true} : vector<8x1xf32> -> vector<8x1xf32>
    %41 = vector.broadcast %40 : vector<8x1xf32> to vector<8x8xf32>
    %42 = arith.mulf %39, %41 : vector<8x8xf32>
    %43 = arith.truncf %42 : vector<8x8xf32> to vector<8x8xbf16>
    %c0_13 = arith.constant 0 : index
    %c8 = arith.constant 8 : index
    %44 = vector.load %arg3[%c0_13, %c8] : memref<8x32xbf16, #tpu.memory_space<vmem>>, vector<8x8xbf16>
    tpu.vector_store %arg3[%c0_13, %c8], %43 {strides = array<i32>} : memref<8x32xbf16, #tpu.memory_space<vmem>>, vector<8x8xbf16>,
    %45 = vector.extract_strided_slice %0 {offsets = [0, 16], sizes = [8, 8], strides = [1, 1]} : vector<8x96xbf16> to vector<8x8xbf16>
    %46 = vector.extract_strided_slice %0 {offsets = [0, 48], sizes = [8, 8], strides = [1, 1]} : vector<8x96xbf16> to vector<8x8xbf16>
    %47 = vector.extract_strided_slice %0 {offsets = [0, 80], sizes = [8, 8], strides = [1, 1]} : vector<8x96xbf16> to vector<8x8xbf16>
    %48 = tpu.transpose %46, [1, 0] : vector<8x8xbf16> -> vector<8x8xbf16>
    %cst_14 = arith.constant dense<0.000000e+00> : vector<8x8xf32>
    %49 = tpu.matmul %45, %48, %cst_14 {dimension_numbers = #tpu.dot_dimension_numbers<[1], [0], [0], [1], [0, 0, 1, 1], [], []>} : vector<8x8xbf16>, vector<8x8xbf16>, vector<8x8xf32> -> vector<8x8xf32>
    %50 = vector.broadcast %2 : vector<1x8xf32> to vector<8x8xf32>
    %51 = arith.addf %49, %50 : vector<8x8xf32>
    %cst_15 = arith.constant dense<0xFF800000> : vector<8xf32>
    %52 = vector.multi_reduction <maximumf>, %51, %cst_15 [1] : vector<8x8xf32> to vector<8xf32>
    %53 = vector.shape_cast %52 : vector<8xf32> to vector<8x1xf32>
    %54 = vector.broadcast %53 : vector<8x1xf32> to vector<8x8xf32>
    %55 = arith.subf %51, %54 : vector<8x8xf32>
    %56 = math.exp %55 : vector<8x8xf32>
    %cst_16 = arith.constant dense<0.000000e+00> : vector<8xf32>
    %57 = vector.multi_reduction <add>, %56, %cst_16 [1] : vector<8x8xf32> to vector<8xf32>
    %58 = vector.shape_cast %57 : vector<8xf32> to vector<8x1xf32>
    %59 = arith.truncf %56 : vector<8x8xf32> to vector<8x8xbf16>
    %cst_17 = arith.constant dense<0.000000e+00> : vector<8x8xf32>
    %60 = tpu.matmul %59, %47, %cst_17 {dimension_numbers = #tpu.dot_dimension_numbers<[1], [0], [0], [1], [0, 0, 1, 1], [], []>} : vector<8x8xbf16>, vector<8x8xbf16>, vector<8x8xf32> -> vector<8x8xf32>
    %61 = tpu.reciprocal %58 {approx = true} : vector<8x1xf32> -> vector<8x1xf32>
    %62 = vector.broadcast %61 : vector<8x1xf32> to vector<8x8xf32>
    %63 = arith.mulf %60, %62 : vector<8x8xf32>
    %64 = arith.truncf %63 : vector<8x8xf32> to vector<8x8xbf16>
    %c0_18 = arith.constant 0 : index
    %c16 = arith.constant 16 : index
    %65 = vector.load %arg3[%c0_18, %c16] : memref<8x32xbf16, #tpu.memory_space<vmem>>, vector<8x8xbf16>
    tpu.vector_store %arg3[%c0_18, %c16], %64 {strides = array<i32>} : memref<8x32xbf16, #tpu.memory_space<vmem>>, vector<8x8xbf16>,
    %66 = vector.extract_strided_slice %0 {offsets = [0, 24], sizes = [8, 8], strides = [1, 1]} : vector<8x96xbf16> to vector<8x8xbf16>
    %67 = vector.extract_strided_slice %0 {offsets = [0, 56], sizes = [8, 8], strides = [1, 1]} : vector<8x96xbf16> to vector<8x8xbf16>
    %68 = vector.extract_strided_slice %0 {offsets = [0, 88], sizes = [8, 8], strides = [1, 1]} : vector<8x96xbf16> to vector<8x8xbf16>
    %69 = tpu.transpose %67, [1, 0] : vector<8x8xbf16> -> vector<8x8xbf16>
    %cst_19 = arith.constant dense<0.000000e+00> : vector<8x8xf32>
    %70 = tpu.matmul %66, %69, %cst_19 {dimension_numbers = #tpu.dot_dimension_numbers<[1], [0], [0], [1], [0, 0, 1, 1], [], []>} : vector<8x8xbf16>, vector<8x8xbf16>, vector<8x8xf32> -> vector<8x8xf32>
    %71 = vector.broadcast %2 : vector<1x8xf32> to vector<8x8xf32>
    %72 = arith.addf %70, %71 : vector<8x8xf32>
    %cst_20 = arith.constant dense<0xFF800000> : vector<8xf32>
    %73 = vector.multi_reduction <maximumf>, %72, %cst_20 [1] : vector<8x8xf32> to vector<8xf32>
    %74 = vector.shape_cast %73 : vector<8xf32> to vector<8x1xf32>
    %75 = vector.broadcast %74 : vector<8x1xf32> to vector<8x8xf32>
    %76 = arith.subf %72, %75 : vector<8x8xf32>
    %77 = math.exp %76 : vector<8x8xf32>
    %cst_21 = arith.constant dense<0.000000e+00> : vector<8xf32>
    %78 = vector.multi_reduction <add>, %77, %cst_21 [1] : vector<8x8xf32> to vector<8xf32>
    %79 = vector.shape_cast %78 : vector<8xf32> to vector<8x1xf32>
    %80 = arith.truncf %77 : vector<8x8xf32> to vector<8x8xbf16>
    %cst_22 = arith.constant dense<0.000000e+00> : vector<8x8xf32>
    %81 = tpu.matmul %80, %68, %cst_22 {dimension_numbers = #tpu.dot_dimension_numbers<[1], [0], [0], [1], [0, 0, 1, 1], [], []>} : vector<8x8xbf16>, vector<8x8xbf16>, vector<8x8xf32> -> vector<8x8xf32>
    %82 = tpu.reciprocal %79 {approx = true} : vector<8x1xf32> -> vector<8x1xf32>
    %83 = vector.broadcast %82 : vector<8x1xf32> to vector<8x8xf32>
    %84 = arith.mulf %81, %83 : vector<8x8xf32>
    %85 = arith.truncf %84 : vector<8x8xf32> to vector<8x8xbf16>
    %c0_23 = arith.constant 0 : index
    %c24 = arith.constant 24 : index
    %86 = vector.load %arg3[%c0_23, %c24] : memref<8x32xbf16, #tpu.memory_space<vmem>>, vector<8x8xbf16>
    tpu.vector_store %arg3[%c0_23, %c24], %85 {strides = array<i32>} : memref<8x32xbf16, #tpu.memory_space<vmem>>, vector<8x8xbf16>,
    return
  }
  func.func @transform_0(%arg0: i32) -> (i32, i32) {
    %c0_i32 = arith.constant 0 : i32
    %c0_i32_0 = arith.constant 0 : i32
    return %arg0, %c0_i32 : i32, i32
  }
  func.func @transform_1(%arg0: i32) -> (i32, i32, i32) {
    %c0_i32 = arith.constant 0 : i32
    %c0_i32_0 = arith.constant 0 : i32
    %c0_i32_1 = arith.constant 0 : i32
    return %arg0, %c0_i32, %c0_i32_0 : i32, i32, i32
  }
  func.func @transform_2(%arg0: i32) -> (i32, i32) {
    %c0_i32 = arith.constant 0 : i32
    %c0_i32_0 = arith.constant 0 : i32
    return %arg0, %c0_i32 : i32, i32
  }
}

module attributes {stable_mosaic.version = 11 : i64} {
  func.func @_ffn_kernel(%arg0: i32, %arg1: i32, %arg2: memref<16x32xbf16, #tpu.memory_space<vmem>>, %arg3: memref<32x64xbf16, #tpu.memory_space<vmem>>, %arg4: memref<1x64xf32, #tpu.memory_space<vmem>>, %arg5: memref<64x32xbf16, #tpu.memory_space<vmem>>, %arg6: memref<1x32xf32, #tpu.memory_space<vmem>>, %arg7: memref<16x32xbf16, #tpu.memory_space<vmem>>, %arg8: memref<1x32xf32, #tpu.memory_space<vmem>>, %arg9: memref<1x32xf32, #tpu.memory_space<vmem>>, %arg10: memref<16x32xbf16, #tpu.memory_space<vmem>>, %arg11: memref<16x32xf32, #tpu.memory_space<vmem>>) attributes {dimension_semantics = [#tpu.dimension_semantics<parallel>, #tpu.dimension_semantics<arbitrary>], iteration_bounds = array<i64: 1, 1>, scalar_prefetch = 0 : i64, scratch_operands = 1 : i64, tpu.core_type = #tpu.core_type<tc>, window_params = [{transform_indices = @transform_0, window_bounds = array<i64: 16, 32>}, {transform_indices = @transform_1, window_bounds = array<i64: 32, 64>}, {transform_indices = @transform_2, window_bounds = array<i64: 1, 64>}, {transform_indices = @transform_3, window_bounds = array<i64: 64, 32>}, {pipeline_mode = #tpu.pipeline_mode<synchronous>, transform_indices = @transform_4, window_bounds = array<i64: 1, 32>}, {transform_indices = @transform_5, window_bounds = array<i64: 16, 32>}, {pipeline_mode = #tpu.pipeline_mode<synchronous>, transform_indices = @transform_6, window_bounds = array<i64: 1, 32>}, {pipeline_mode = #tpu.pipeline_mode<synchronous>, transform_indices = @transform_7, window_bounds = array<i64: 1, 32>}, {transform_indices = @transform_8, window_bounds = array<i64: 16, 32>}]} {
    %c0_i32 = arith.constant 0 : i32
    %0 = arith.cmpi eq, %arg1, %c0_i32 : i32
    %1 = arith.extui %0 : i1 to i32
    %c0_i32_0 = arith.constant 0 : i32
    %2 = arith.cmpi ne, %1, %c0_i32_0 : i32
    scf.if %2 {
      %cst_19 = arith.constant 0.000000e+00 : f32
      %31 = vector.broadcast %cst_19 : f32 to vector<16x32xf32>
      %c0_20 = arith.constant 0 : index
      %c0_21 = arith.constant 0 : index
      %32 = vector.load %arg11[%c0_20, %c0_21] : memref<16x32xf32, #tpu.memory_space<vmem>>, vector<16x32xf32>
      tpu.vector_store %arg11[%c0_20, %c0_21], %31 {strides = array<i32>} : memref<16x32xf32, #tpu.memory_space<vmem>>, vector<16x32xf32>,
    } else {
    }
    %c0 = arith.constant 0 : index
    %c0_1 = arith.constant 0 : index
    %3 = vector.load %arg2[%c0, %c0_1] : memref<16x32xbf16, #tpu.memory_space<vmem>>, vector<16x32xbf16>
    %c0_2 = arith.constant 0 : index
    %c0_3 = arith.constant 0 : index
    %4 = vector.load %arg3[%c0_2, %c0_3] : memref<32x64xbf16, #tpu.memory_space<vmem>>, vector<32x64xbf16>
    %cst = arith.constant dense<0.000000e+00> : vector<16x64xf32>
    %5 = tpu.matmul %3, %4, %cst {dimension_numbers = #tpu.dot_dimension_numbers<[1], [0], [0], [1], [0, 0, 1, 1], [], []>} : vector<16x32xbf16>, vector<32x64xbf16>, vector<16x64xf32> -> vector<16x64xf32>
    %c0_4 = arith.constant 0 : index
    %c0_5 = arith.constant 0 : index
    %6 = vector.load %arg4[%c0_4, %c0_5] : memref<1x64xf32, #tpu.memory_space<vmem>>, vector<1x64xf32>
    %7 = vector.broadcast %6 : vector<1x64xf32> to vector<16x64xf32>
    %8 = arith.addf %5, %7 : vector<16x64xf32>
    %cst_6 = arith.constant 5.000000e-01 : f32
    %9 = vector.broadcast %cst_6 : f32 to vector<16x64xf32>
    %10 = arith.mulf %9, %8 : vector<16x64xf32>
    %cst_7 = arith.constant 4.471500e-02 : f32
    %11 = vector.broadcast %cst_7 : f32 to vector<16x64xf32>
    %12 = arith.mulf %11, %8 : vector<16x64xf32>
    %13 = arith.mulf %12, %8 : vector<16x64xf32>
    %14 = arith.mulf %13, %8 : vector<16x64xf32>
    %15 = arith.addf %8, %14 : vector<16x64xf32>
    %cst_8 = arith.constant 0.797884583 : f32
    %16 = vector.broadcast %cst_8 : f32 to vector<16x64xf32>
    %17 = arith.mulf %16, %15 : vector<16x64xf32>
    %18 = math.tanh %17 : vector<16x64xf32>
    %cst_9 = arith.constant 1.000000e+00 : f32
    %19 = vector.broadcast %cst_9 : f32 to vector<16x64xf32>
    %20 = arith.addf %19, %18 : vector<16x64xf32>
    %21 = arith.mulf %10, %20 : vector<16x64xf32>
    %c0_10 = arith.constant 0 : index
    %c0_11 = arith.constant 0 : index
    %22 = vector.load %arg11[%c0_10, %c0_11] : memref<16x32xf32, #tpu.memory_space<vmem>>, vector<16x32xf32>
    %23 = arith.truncf %21 : vector<16x64xf32> to vector<16x64xbf16>
    %c0_12 = arith.constant 0 : index
    %c0_13 = arith.constant 0 : index
    %24 = vector.load %arg5[%c0_12, %c0_13] : memref<64x32xbf16, #tpu.memory_space<vmem>>, vector<64x32xbf16>
    %cst_14 = arith.constant dense<0.000000e+00> : vector<16x32xf32>
    %25 = tpu.matmul %23, %24, %cst_14 {dimension_numbers = #tpu.dot_dimension_numbers<[1], [0], [0], [1], [0, 0, 1, 1], [], []>} : vector<16x64xbf16>, vector<64x32xbf16>, vector<16x32xf32> -> vector<16x32xf32>
    %26 = arith.addf %22, %25 : vector<16x32xf32>
    %c0_15 = arith.constant 0 : index
    %c0_16 = arith.constant 0 : index
    %27 = vector.load %arg11[%c0_15, %c0_16] : memref<16x32xf32, #tpu.memory_space<vmem>>, vector<16x32xf32>
    tpu.vector_store %arg11[%c0_15, %c0_16], %26 {strides = array<i32>} : memref<16x32xf32, #tpu.memory_space<vmem>>, vector<16x32xf32>,
    %c0_i32_17 = arith.constant 0 : i32
    %28 = arith.cmpi eq, %arg1, %c0_i32_17 : i32
    %29 = arith.extui %28 : i1 to i32
    %c0_i32_18 = arith.constant 0 : i32
    %30 = arith.cmpi ne, %29, %c0_i32_18 : i32
    scf.if %30 {
      %c0_19 = arith.constant 0 : index
      %c0_20 = arith.constant 0 : index
      %31 = vector.load %arg11[%c0_19, %c0_20] : memref<16x32xf32, #tpu.memory_space<vmem>>, vector<16x32xf32>
      %c0_21 = arith.constant 0 : index
      %c0_22 = arith.constant 0 : index
      %32 = vector.load %arg6[%c0_21, %c0_22] : memref<1x32xf32, #tpu.memory_space<vmem>>, vector<1x32xf32>
      %33 = vector.broadcast %32 : vector<1x32xf32> to vector<16x32xf32>
      %34 = arith.addf %31, %33 : vector<16x32xf32>
      %c0_23 = arith.constant 0 : index
      %c0_24 = arith.constant 0 : index
      %35 = vector.load %arg7[%c0_23, %c0_24] : memref<16x32xbf16, #tpu.memory_space<vmem>>, vector<16x32xbf16>
      %36 = arith.extf %35 : vector<16x32xbf16> to vector<16x32xf32>
      %37 = arith.addf %34, %36 : vector<16x32xf32>
      %cst_25 = arith.constant dense<0.000000e+00> : vector<16xf32>
      %38 = vector.multi_reduction <add>, %37, %cst_25 [1] : vector<16x32xf32> to vector<16xf32>
      %39 = vector.shape_cast %38 : vector<16xf32> to vector<16x1xf32>
      %cst_26 = arith.constant 3.200000e+01 : f32
      %40 = vector.broadcast %cst_26 : f32 to vector<16x1xf32>
      %41 = arith.divf %39, %40 : vector<16x1xf32>
      %42 = vector.broadcast %41 : vector<16x1xf32> to vector<16x32xf32>
      %43 = arith.subf %37, %42 : vector<16x32xf32>
      %44 = arith.mulf %43, %43 : vector<16x32xf32>
      %cst_27 = arith.constant dense<0.000000e+00> : vector<16xf32>
      %45 = vector.multi_reduction <add>, %44, %cst_27 [1] : vector<16x32xf32> to vector<16xf32>
      %46 = vector.shape_cast %45 : vector<16xf32> to vector<16x1xf32>
      %cst_28 = arith.constant 3.200000e+01 : f32
      %47 = vector.broadcast %cst_28 : f32 to vector<16x1xf32>
      %48 = arith.divf %46, %47 : vector<16x1xf32>
      %49 = vector.broadcast %41 : vector<16x1xf32> to vector<16x32xf32>
      %50 = arith.subf %37, %49 : vector<16x32xf32>
      %cst_29 = arith.constant 9.99999996E-13 : f32
      %51 = vector.broadcast %cst_29 : f32 to vector<16x1xf32>
      %52 = arith.addf %48, %51 : vector<16x1xf32>
      %53 = math.rsqrt %52 : vector<16x1xf32>
      %54 = vector.broadcast %53 : vector<16x1xf32> to vector<16x32xf32>
      %55 = arith.mulf %50, %54 : vector<16x32xf32>
      %c0_30 = arith.constant 0 : index
      %c0_31 = arith.constant 0 : index
      %56 = vector.load %arg8[%c0_30, %c0_31] : memref<1x32xf32, #tpu.memory_space<vmem>>, vector<1x32xf32>
      %57 = vector.broadcast %56 : vector<1x32xf32> to vector<16x32xf32>
      %58 = arith.mulf %55, %57 : vector<16x32xf32>
      %c0_32 = arith.constant 0 : index
      %c0_33 = arith.constant 0 : index
      %59 = vector.load %arg9[%c0_32, %c0_33] : memref<1x32xf32, #tpu.memory_space<vmem>>, vector<1x32xf32>
      %60 = vector.broadcast %59 : vector<1x32xf32> to vector<16x32xf32>
      %61 = arith.addf %58, %60 : vector<16x32xf32>
      %62 = arith.truncf %61 : vector<16x32xf32> to vector<16x32xbf16>
      %c0_34 = arith.constant 0 : index
      %c0_35 = arith.constant 0 : index
      %63 = vector.load %arg10[%c0_34, %c0_35] : memref<16x32xbf16, #tpu.memory_space<vmem>>, vector<16x32xbf16>
      tpu.vector_store %arg10[%c0_34, %c0_35], %62 {strides = array<i32>} : memref<16x32xbf16, #tpu.memory_space<vmem>>, vector<16x32xbf16>,
    } else {
    }
    return
  }
  func.func @transform_0(%arg0: i32, %arg1: i32) -> (i32, i32) {
    %c0_i32 = arith.constant 0 : i32
    %c0_i32_0 = arith.constant 0 : i32
    return %arg0, %c0_i32 : i32, i32
  }
  func.func @transform_1(%arg0: i32, %arg1: i32) -> (i32, i32) {
    %c0_i32 = arith.constant 0 : i32
    %c0_i32_0 = arith.constant 0 : i32
    return %c0_i32, %arg1 : i32, i32
  }
  func.func @transform_2(%arg0: i32, %arg1: i32) -> (i32, i32) {
    %c0_i32 = arith.constant 0 : i32
    %c0_i32_0 = arith.constant 0 : i32
    return %c0_i32, %arg1 : i32, i32
  }
  func.func @transform_3(%arg0: i32, %arg1: i32) -> (i32, i32) {
    %c0_i32 = arith.constant 0 : i32
    %c0_i32_0 = arith.constant 0 : i32
    return %arg1, %c0_i32 : i32, i32
  }
  func.func @transform_4(%arg0: i32, %arg1: i32) -> (i32, i32) {
    %c0_i32 = arith.constant 0 : i32
    %c0_i32_0 = arith.constant 0 : i32
    %c0_i32_1 = arith.constant 0 : i32
    return %c0_i32, %c0_i32_0 : i32, i32
  }
  func.func @transform_5(%arg0: i32, %arg1: i32) -> (i32, i32) {
    %c0_i32 = arith.constant 0 : i32
    %c0_i32_0 = arith.constant 0 : i32
    return %arg0, %c0_i32 : i32, i32
  }
  func.func @transform_6(%arg0: i32, %arg1: i32) -> (i32, i32) {
    %c0_i32 = arith.constant 0 : i32
    %c0_i32_0 = arith.constant 0 : i32
    %c0_i32_1 = arith.constant 0 : i32
    return %c0_i32, %c0_i32_0 : i32, i32
  }
  func.func @transform_7(%arg0: i32, %arg1: i32) -> (i32, i32) {
    %c0_i32 = arith.constant 0 : i32
    %c0_i32_0 = arith.constant 0 : i32
    %c0_i32_1 = arith.constant 0 : i32
    return %c0_i32, %c0_i32_0 : i32, i32
  }
  func.func @transform_8(%arg0: i32, %arg1: i32) -> (i32, i32) {
    %c0_i32 = arith.constant 0 : i32
    %c0_i32_0 = arith.constant 0 : i32
    return %arg0, %c0_i32 : i32, i32
  }
}

</mosaic_0001>

<bundles_post_ra>
// kernel: forward.10
= control target key start
LH: loop header
LB: loop body
LE: loop exit
PB: predicated region body
PF: predicated region fallthrough
CT: control target
= control target key end

     0   :  { %vm19_vm0 = vcmask 785408   ;;  %v151_v0 = vmov 0.0   ;;  %vm152_vm1 = vmmov 0   ;;  %vm47_vm2 = vcmask 261120   ;;  %s195_s1 = inlined_call_operand.vmem [shape: bf16[32,96], index: 1, kind: input, shape index: {}]   ;;  %s196_s0 = inlined_call_operand.vmem [shape: bf16[16,32], index: 0, kind: input, shape index: {}]   ;;  %s197_s2 = inlined_call_operand.vmem [shape: f32[1,96], index: 2, kind: input, shape index: {}]   ;;  %s198_s3 = inlined_call_operand.vmem [shape: bf16[16,96], index: 3, kind: output, shape index: {}]  }
   0x1   :  { %138 = vmatprep.subr.bf16.mxu0 %v151_v0  ;;  %v148_v1 = vld [vmem:[%s195_s1] sm:$0xff]   ;;  %142 = vmatprep.mubr.msk.bf16.mxu0 %vm152_vm1, %v151_v0  ;;  %20 = vst.msk [vmem:[#allocation2] sm:$0xff] %vm19_vm0, %v151_v0  ;;  %21 = vst.msk [vmem:[#allocation2 + $0x8] sm:$0xff] %vm19_vm0, %v151_v0  ;;  %v149_v2 = vld [vmem:[%s195_s1 + $0x8] sm:$0xff]   ;;  %vm119_vm3 = vcmask 781312  }
   0x2   :  { %139 = vmatpush3.bf16.msra.mxu0 %v148_v1  ;;  %v150_v3 = vld [vmem:[%s196_s0] sm:$0xff]  }
   0x3   :  { %140 = vmatprep.subr.bf16.mxu0 %v151_v0  ;;  %v130_v12 = vld [vmem:[%s197_s2] ss:$0 sm:$0xff] }
   0x6   :  { %141 = vmatpush3.bf16.msra.mxu0 %v149_v2 }
   0x8   :  { %v22_v4 = vld [vmem:[#allocation2] sm:$0xff]  ;;  %v23_v6 = vld [vmem:[#allocation2 + $0x8] sm:$0xff] }
   0x9   :  { %143 = vmatmul.mubr.msk.bf16.vlgmr.msra.gmra.mrb[0].mxu0 %vm47_vm2, %v150_v3 }
  0xdc   :  { %v85_v5 = vpop.f32.mrb[0].mxu0 }
  0xdd   :  { %v92_v7 = vadd.f32 %v85_v5, %v22_v4  ;;  %v144_v8 = vpop.f32.mrb[1].mxu0 }
  0xde   :  { %v88_v9 = vpop.f32.mrb[2].mxu0 }
  0xdf   :  { %95 = vst.msk [vmem:[#allocation2] sm:$0xff] %vm19_vm0, %v92_v7  ;;  %v93_v10 = vadd.f32 %v88_v9, %v23_v6  ;;  %v145_v11 = vpop.f32.mrb[3].mxu0 }
  0xe1   :  { %96 = vst.msk [vmem:[#allocation2 + $0x8] sm:$0xff] %vm19_vm0, %v93_v10 }
  0xe6   :  { %v100_v13 = vld [vmem:[#allocation2] sm:$0xff] }
  0xe7   :  { %v109_v14 = vadd.f32 %v130_v12, %v100_v13 }
  0xe8   :  { %v101_v15 = vld [vmem:[#allocation2 + $0x8] sm:$0xff] }
  0xe9   :  { %v133_v16 = vpack.c.bf16 %v109_v14, %v109_v14  ;;  %v110_v17 = vadd.f32 %v130_v12, %v101_v15 }
  0xeb   :  { %120 = vst.msk [vmem:[%s198_s3] sm:$0xf] %vm119_vm3, %v133_v16  ;;  %v134_v18 = vpack.c.bf16 %v110_v17, %v110_v17 }
  0xed   :  { %121 = vst.msk [vmem:[%s198_s3 + $0x4] sm:$0xf] %vm119_vm3, %v134_v18 }

// kernel: forward.9
= control target key start
LH: loop header
LB: loop body
LE: loop exit
PB: predicated region body
PF: predicated region fallthrough
CT: control target
= control target key end

     0   :  { %vm16_vm0 = vcmask 261120   ;;  %vm70_vm1 = vcmask 257024   ;;  %s129_s0 = inlined_call_operand.vmem [shape: f32[16,32], index: 0, kind: input, shape index: {}]   ;;  %s130_s1 = inlined_call_operand.vmem [shape: f32[1,32], index: 1, kind: input, shape index: {}]   ;;  %s131_s2 = inlined_call_operand.vmem [shape: f32[1,32], index: 2, kind: input, shape index: {}]   ;;  %s132_s3 = inlined_call_operand.vmem [shape: bf16[16,32], index: 3, kind: output, shape index: {}]  }
   0x1   :  { %v14_v0 = vld [vmem:[%s129_s0] sm:$0xff]  ;;  %v15_v1 = vld [vmem:[%s129_s0 + $0x8] sm:$0xff] }
   0x2   :  { %v17_v2 = vsel %vm16_vm0, %v14_v0, 0.0  ;;  %v20_v3 = vsel %vm16_vm0, %v15_v1, 0.0  ;;  %v77_v21 = vld [vmem:[%s130_s1] ss:$0 sm:$0xff] }
   0x3   :  { %18 = vadd.xlane.f32.xlu0 %v17_v2  ;;  %v78_v23 = vld [vmem:[%s131_s2] ss:$0 sm:$0xff] }
   0x7   :  { %21 = vadd.xlane.f32.xlu0 %v20_v3 }
  0x90   :  { %v19_v4 = vpop.xlane.xlu0 %18 }
  0x91   :  { %v24_v5 = vmul.f32 0.03125, %v19_v4 }
  0x93   :  { %v26_v6 = vsub.f32 %v14_v0, %v24_v5 }
  0x94   :  { %v22_v7 = vpop.xlane.xlu0 %21 }
  0x95   :  { %v25_v8 = vmul.f32 0.03125, %v22_v7  ;;  %v28_v9 = vmul.f32 %v26_v6, %v26_v6 }
  0x97   :  { %v27_v10 = vsub.f32 %v15_v1, %v25_v8  ;;  %v30_v11 = vsel %vm16_vm0, %v28_v9, 0.0 }
  0x98   :  { %31 = vadd.xlane.f32.xlu1 %v30_v11 }
  0x99   :  { %v29_v12 = vmul.f32 %v27_v10, %v27_v10 }
  0x9b   :  { %v33_v13 = vsel %vm16_vm0, %v29_v12, 0.0 }
  0x9c   :  { %34 = vadd.xlane.f32.xlu1 %v33_v13 }
 0x125   :  { %v32_v14 = vpop.xlane.xlu1 %31 }
 0x126   :  { %v36_v15 = vmul.f32 0.03125, %v32_v14 }
 0x128   :  { %v38_v16 = vadd.f32 1e-12, %v36_v15 }
 0x129   :  { %v35_v17 = vpop.xlane.xlu1 %34 }
 0x12a   :  { %83 = vrsqrt.f32 %v38_v16  ;;  %v37_v18 = vmul.f32 0.03125, %v35_v17 }
 0x12c   :  { %v39_v19 = vadd.f32 1e-12, %v37_v18 }
 0x12e   :  { %85 = vrsqrt.f32 %v39_v19 }
 0x134   :  { %v84_v20 = vpop.eup %83 }
 0x135   :  { %v42_v22 = vmul.f32 %v84_v20, %v26_v6 }
 0x137   :  { %v51_v24 = vmul.f32 %v77_v21, %v42_v22 }
 0x138   :  { %v86_v25 = vpop.eup %85 }
 0x139   :  { %v60_v26 = vadd.f32 %v78_v23, %v51_v24  ;;  %v43_v27 = vmul.f32 %v86_v25, %v27_v10 }
 0x13b   :  { %v81_v28 = vpack.c.bf16 %v60_v26, %v60_v26  ;;  %v52_v29 = vmul.f32 %v77_v21, %v43_v27 }
 0x13d   :  { %71 = vst.msk [vmem:[%s132_s3] sm:$0xf] %vm70_vm1, %v81_v28  ;;  %v61_v30 = vadd.f32 %v78_v23, %v52_v29 }
 0x13f   :  { %v82_v31 = vpack.c.bf16 %v61_v30, %v61_v30 }
 0x141   :  { %72 = vst.msk [vmem:[%s132_s3 + $0x4] sm:$0xf] %vm70_vm1, %v82_v31 }

// kernel: forward.12
= control target key start
LH: loop header
LB: loop body
LE: loop exit
PB: predicated region body
PF: predicated region fallthrough
CT: control target
= control target key end

     0   :  { %vm28_vm0 = vcmask 261120   ;;  %v220_v0 = vmov 0.0   ;;  %vm221_vm1 = vmmov 0   ;;  %vm178_vm2 = vcmask 257024   ;;  %s293_s1 = inlined_call_operand.vmem [shape: bf16[32,32], index: 1, kind: input, shape index: {}]   ;;  %s294_s0 = inlined_call_operand.vmem [shape: bf16[16,32], index: 0, kind: input, shape index: {}]   ;;  %s295_s3 = inlined_call_operand.vmem [shape: bf16[16,32], index: 3, kind: input, shape index: {}]   ;;  %s296_s2 = inlined_call_operand.vmem [shape: f32[1,32], index: 2, kind: input, shape index: {}]   ;;  %s297_s4 = inlined_call_operand.vmem [shape: f32[1,32], index: 4, kind: input, shape index: {}]   ;;  %s298_s5 = inlined_call_operand.vmem [shape: f32[1,32], index: 5, kind: input, shape index: {}]   ;;  %s299_s6 = inlined_call_operand.vmem [shape: bf16[16,32], index: 6, kind: output, shape index: {}]  }
   0x1   :  { %203 = vmatprep.subr.bf16.mxu0 %v220_v0  ;;  %v213_v1 = vld [vmem:[%s293_s1] sm:$0xff]   ;;  %207 = vmatprep.mubr.msk.bf16.mxu0 %vm221_vm1, %v220_v0  ;;  %29 = vst.msk [vmem:[#allocation2] sm:$0xff] %vm28_vm0, %v220_v0  ;;  %30 = vst.msk [vmem:[#allocation2 + $0x8] sm:$0xff] %vm28_vm0, %v220_v0  ;;  %v214_v2 = vld [vmem:[%s293_s1 + $0x8] sm:$0xff]  }
   0x2   :  { %204 = vmatpush3.bf16.msra.mxu0 %v213_v1  ;;  %v215_v3 = vld [vmem:[%s294_s0] sm:$0xff]  }
   0x3   :  { %205 = vmatprep.subr.bf16.mxu0 %v220_v0  ;;  %v197_v12 = vld [vmem:[%s295_s3] sm:$0xff]  }
   0x4   :  { %v189_v13 = vld [vmem:[%s296_s2] ss:$0 sm:$0xff]  ;;  %v198_v14 = vunpack.c.l.bf16 %v197_v12  ;;  %v199_v17 = vunpack.c.h.bf16 %v197_v12 }
   0x5   :  { %v190_v41 = vld [vmem:[%s297_s4] ss:$0 sm:$0xff] }
   0x6   :  { %206 = vmatpush3.bf16.msra.mxu0 %v214_v2  ;;  %v191_v43 = vld [vmem:[%s298_s5] ss:$0 sm:$0xff] }
   0x8   :  { %v31_v4 = vld [vmem:[#allocation2] sm:$0xff]  ;;  %v32_v6 = vld [vmem:[#allocation2 + $0x8] sm:$0xff] }
   0x9   :  { %208 = vmatmul.mubr.msk.bf16.vlgmr.msra.gmra.mrb[0].mxu0 %vm28_vm0, %v215_v3 }
  0xdc   :  { %v94_v5 = vpop.f32.mrb[0].mxu0 }
  0xdd   :  { %v101_v7 = vadd.f32 %v94_v5, %v31_v4  ;;  %v209_v8 = vpop.f32.mrb[1].mxu0 }
  0xde   :  { %v97_v9 = vpop.f32.mrb[2].mxu0 }
  0xdf   :  { %103 = vst.msk [vmem:[#allocation2] sm:$0xff] %vm28_vm0, %v101_v7  ;;  %v102_v10 = vadd.f32 %v97_v9, %v32_v6  ;;  %v210_v11 = vpop.f32.mrb[3].mxu0 }
  0xe1   :  { %104 = vst.msk [vmem:[#allocation2 + $0x8] sm:$0xff] %vm28_vm0, %v102_v10 }
  0xe6   :  { %v108_v15 = vld [vmem:[#allocation2] sm:$0xff] }
  0xe7   :  { %v117_v16 = vadd.f32 %v189_v13, %v108_v15 }
  0xe8   :  { %v109_v18 = vld [vmem:[#allocation2 + $0x8] sm:$0xff] }
  0xe9   :  { %v123_v19 = vadd.f32 %v198_v14, %v117_v16  ;;  %v118_v20 = vadd.f32 %v189_v13, %v109_v18 }
  0xeb   :  { %v125_v21 = vsel %vm28_vm0, %v123_v19, 0.0  ;;  %v124_v22 = vadd.f32 %v199_v17, %v118_v20 }
  0xec   :  { %126 = vadd.xlane.f32.xlu0 %v125_v21 }
  0xed   :  { %v128_v23 = vsel %vm28_vm0, %v124_v22, 0.0 }
  0xf0   :  { %129 = vadd.xlane.f32.xlu0 %v128_v23 }
 0x179   :  { %v127_v24 = vpop.xlane.xlu0 %126 }
 0x17a   :  { %v132_v25 = vmul.f32 0.03125, %v127_v24 }
 0x17c   :  { %v134_v26 = vsub.f32 %v123_v19, %v132_v25 }
 0x17d   :  { %v130_v27 = vpop.xlane.xlu0 %129 }
 0x17e   :  { %v133_v28 = vmul.f32 0.03125, %v130_v27  ;;  %v136_v29 = vmul.f32 %v134_v26, %v134_v26 }
 0x180   :  { %v135_v30 = vsub.f32 %v124_v22, %v133_v28  ;;  %v138_v31 = vsel %vm28_vm0, %v136_v29, 0.0 }
 0x181   :  { %139 = vadd.xlane.f32.xlu1 %v138_v31 }
 0x182   :  { %v137_v32 = vmul.f32 %v135_v30, %v135_v30 }
 0x184   :  { %v141_v33 = vsel %vm28_vm0, %v137_v32, 0.0 }
 0x185   :  { %142 = vadd.xlane.f32.xlu1 %v141_v33 }
 0x20e   :  { %v140_v34 = vpop.xlane.xlu1 %139 }
 0x20f   :  { %v144_v35 = vmul.f32 0.03125, %v140_v34 }
 0x211   :  { %v146_v36 = vadd.f32 1e-12, %v144_v35 }
 0x212   :  { %v143_v37 = vpop.xlane.xlu1 %142 }
 0x213   :  { %216 = vrsqrt.f32 %v146_v36  ;;  %v145_v38 = vmul.f32 0.03125, %v143_v37 }
 0x215   :  { %v147_v39 = vadd.f32 1e-12, %v145_v38 }
 0x217   :  { %218 = vrsqrt.f32 %v147_v39 }
 0x21d   :  { %v217_v40 = vpop.eup %216 }
 0x21e   :  { %v150_v42 = vmul.f32 %v217_v40, %v134_v26 }
 0x220   :  { %v159_v44 = vmul.f32 %v190_v41, %v150_v42 }
 0x221   :  { %v219_v45 = vpop.eup %218 }
 0x222   :  { %v168_v46 = vadd.f32 %v191_v43, %v159_v44  ;;  %v151_v47 = vmul.f32 %v219_v45, %v135_v30 }
 0x224   :  { %v194_v48 = vpack.c.bf16 %v168_v46, %v168_v46  ;;  %v160_v49 = vmul.f32 %v190_v41, %v151_v47 }
 0x226   :  { %179 = vst.msk [vmem:[%s299_s6] sm:$0xf] %vm178_vm2, %v194_v48  ;;  %v169_v50 = vadd.f32 %v191_v43, %v160_v49 }
 0x228   :  { %v195_v51 = vpack.c.bf16 %v169_v50, %v169_v50 }
 0x22a   :  { %180 = vst.msk [vmem:[%s299_s6 + $0x4] sm:$0xf] %vm178_vm2, %v195_v51 }

// kernel: forward.11
= control target key start
LH: loop header
LB: loop body
LE: loop exit
PB: predicated region body
PF: predicated region fallthrough
CT: control target
= control target key end

     0   :  { %s866_s9 = smov 0   ;;  %s975_s0 = inlined_call_operand.vmem [shape: bf16[16,96], index: 0, kind: input, shape index: {}]   ;;  %s976_s1 = inlined_call_operand.vmem [shape: f32[2,1,8], index: 1, kind: input, shape index: {}]   ;;  %s977_s2 = inlined_call_operand.vmem [shape: bf16[16,32], index: 2, kind: output, shape index: {}]  }
   0x1 LB: > { %s697_s10 = sadd.s32 4294967295, %s833_s9   ;;  %p701_p0 = scmp.ge.s32.totalorder %s833_s9, 1  ;;  %s833_s9 = sphi %s866_s9, %s12_s9  }
   0x2   : > { %p119_p1 = scmp.lt.s32.totalorder %s833_s9, 3 }
   0x4   : > { %p120_p2 = pnand %p701_p0, %p119_p1 }
   0x5   : > { %p142_p3 = scmp.lt.s32.totalorder (!%p120_p2), %s697_s10, 1  ;;  %v835_v0 = vmov (!%p120_p2), 0.0   ;;  %vm836_vm0 = vmmov (!%p120_p2), 0   ;;  %s837_s15 = smov (!%p120_p2), 96   ;;  %vm167_vm1 = vcmask (!%p120_p2), 64512   ;;  %vm229_vm2 = vcmask (!%p120_p2), 1043456  }
   0x6   : > { %123 = sbr.rel (%p120_p2) target bundleno = 1246 (0x4de), region = 28  ;;  %738 = vmatprep.subr.bf16.mxu0 (!%p120_p2), %v835_v0  ;;  %740 = vmatprep.mubr.msk.bf16.mxu0 (!%p120_p2), %vm836_vm0, %v835_v0  ;;  %s838_s16 = smov (!%p120_p2), 64   ;;  %vm276_vm3 = vcmask (!%p120_p2), 60416   ;;  %vm395_vm4 = vcmask (!%p120_p2), 126016   ;;  %vm514_vm5 = vcmask (!%p120_p2), 191616   ;;  %vm633_vm6 = vcmask (!%p120_p2), 257216  }
   0x7   : > { %744 = vmatprep.subr.bf16.mxu1 (!%p120_p2), %v835_v0  ;;  %746 = vmatprep.mubr.msk.bf16.mxu1 (!%p120_p2), %vm836_vm0, %v835_v0  ;;  %s839_s17 = smov (!%p120_p2), 88   ;;  %s840_s18 = smov (!%p120_p2), 120  }
   0x8   : > { %s841_s19 = smov (!%p120_p2), 80   ;;  %s842_s20 = smov (!%p120_p2), 112  }
   0x9   : > { %s843_s21 = smov (!%p120_p2), 72   ;;  %s844_s22 = smov (!%p120_p2), 104  }
   0xa   : > { %s845_s26 = smov (!%p120_p2), 56   ;;  %s846_s27 = smov (!%p120_p2), 48  }
   0xb   : > { %s847_s28 = smov (!%p120_p2), 40   ;;  %s848_s4 = smov (!%p120_p2), 8  }
   0xc   : > { %s849_s5 = smov (!%p120_p2), 16   ;;  %s850_s6 = smov (!%p120_p2), 24  }
   0xd   : > { %s979_s10 = smov (!%p142_p3, %s697_s10), 1 }
   0xe   : > { %s702_s11 = sshll.u32 %s979_s10, 2  ;;  %s148_s25 = scalar_lea.vmem %s976_s1, %s979_s10 }
   0xf   : > { %s145_s14 = scalar_lea.vmem %s975_s0, %s702_s11  ;;  %v907_v5 = vld [vmem:[%s148_s25] ss:$0 sm:$0xff]  ;;  %s966_s3 = scalar_lea.vmem %s977_s2, %s702_s11 }
  0x10   : > { %v154_v1 = vld [vmem:[%s145_s14] sm:$0xf] }
  0x11   : > { %v888_v2 = vcombine.low %v154_v1, %v154_v1 }
  0x13   : > { %165 = vrot.lane.b32.xlu0 %v888_v2, %s837_s15  ;;  %224 = vrot.lane.b32.xlu1 %v888_v2, %s838_s16 }
  0x17   : > { %280 = vrot.lane.b32.xlu1 %v888_v2, %s839_s17 }
  0x1b   : > { %278 = vrot.lane.b32.xlu1 %v888_v2, %s840_s18 }
  0x1f   : > { %399 = vrot.lane.b32.xlu1 %v888_v2, %s841_s19 }
  0x23   : > { %397 = vrot.lane.b32.xlu1 %v888_v2, %s842_s20 }
  0x27   : > { %518 = vrot.lane.b32.xlu1 %v888_v2, %s843_s21 }
  0x2b   : > { %516 = vrot.lane.b32.xlu1 %v888_v2, %s844_s22 }
  0x85   : > { %v166_v3 = vpop.permute.xlu0 %165  ;;  %v225_v12 = vpop.permute.xlu1 %224 }
  0x86   : > { %v172_v4 = vsel %vm167_vm1, %v166_v3, 0  ;;  %v231_v13 = vsel %vm229_vm2, %v225_v12, 0 }
  0x87   : > { %739 = vmatpush3.bf16.xpose.msra.mxu0 %v172_v4  ;;  %745 = vmatpush3.bf16.msra.mxu1 %v231_v13 }
  0x88   : > { %756 = vmatprep.subr.bf16.mxu0 %v835_v0  ;;  %750 = vmatprep.subr.bf16.mxu1 %v835_v0 }
  0x89   : > { %v281_v17 = vpop.permute.xlu1 %280 }
  0x8a   : > { %v286_v20 = vsel %vm167_vm1, %v281_v17, 0 }
  0x8d   : > { %v279_v18 = vpop.permute.xlu1 %278 }
  0x8e   : > { %741 = vmatmul.mubr.msk.bf16.vlgmr.msra.gmra.mrb[0].mxu0 %vm167_vm1, %v154_v1 }
  0x8f   : > { %758 = vmatprep.mubr.msk.bf16.mxu0 %vm836_vm0, %v835_v0 }
  0x91   : > { %v400_v22 = vpop.permute.xlu1 %399 }
  0x92   : > { %v405_v24 = vsel %vm167_vm1, %v400_v22, 0 }
  0x95   : > { %v398_v23 = vpop.permute.xlu1 %397 }
  0x99   : > { %v519_v25 = vpop.permute.xlu1 %518 }
  0x9a   : > { %v524_v26 = vsel %vm167_vm1, %v519_v25, 0 }
  0x9d   : > { %v517_v27 = vpop.permute.xlu1 %516 }
 0x161   : > { %v208_v6 = vpop.f32.mrb[0].mxu0 }
 0x162   : > { %v209_v7 = vadd.f32 %v907_v5, %v208_v6  ;;  %v742_v8 = vpop.f32.mrb[1].mxu0 }
 0x163   : > { %v211_v9 = vpop.f32.mrb[2].mxu0 }
 0x164   : > { %v743_v10 = vpop.f32.mrb[3].mxu0  ;;  %v214_v11 = vsel %vm167_vm1, %v209_v7, -inf }
 0x165   : > { %215 = vmax.xlane.f32.xlu0 %v214_v11 }
 0x17b   : > { %338 = vrot.lane.b32.xlu0 %v888_v2, %s845_s26 }
 0x1f2   : > { %v216_v14 = vpop.xlane.xlu0 %215 }
 0x1f3   : > { %v217_v15 = vsub.f32 %v209_v7, %v216_v14 }
 0x1f5   : > { %v218_v16 = vmul.f32 1.442695, %v217_v15 }
 0x1f6   : > { %v339_v28 = vpop.permute.xlu0 %338 }
 0x1f7   : > { %811 = vpow2.f32 %v218_v16  ;;  %v344_v29 = vsel %vm229_vm2, %v339_v28, 0 }
 0x1f8   : > { %757 = vmatpush3.bf16.msra.mxu0 %v344_v29 }
 0x1f9   : > { %768 = vmatprep.subr.bf16.mxu0 %v835_v0 }
 0x201   : > { %v914_v19 = vpop.eup %811 }
 0x202   : > { %v223_v21 = vpack.c.bf16 %v914_v19, %v914_v19  ;;  %v220_v11 = vsel %vm167_vm1, %v914_v19, 0.0 }
 0x204   : > { %747 = vmatmul.mubr.msk.bf16.vlgmr.msra.gmra.mrb[0].mxu1 %vm167_vm1, %v223_v21 }
 0x205   : > { %751 = vmatpush3.bf16.xpose.msra.mxu1 %v286_v20  ;;  %752 = vmatprep.mubr.msk.bf16.mxu1 %vm836_vm0, %v835_v0 }
 0x206   : > { %762 = vmatprep.subr.bf16.mxu1 %v835_v0 }
 0x20c   : > { %753 = vmatmul.mubr.msk.bf16.vlgmr.msra.gmra.mrb[4].mxu1 %vm167_vm1, %v279_v18 }
 0x20d   : > { %763 = vmatpush3.bf16.xpose.msra.mxu1 %v405_v24  ;;  %764 = vmatprep.mubr.msk.bf16.mxu1 %vm836_vm0, %v835_v0 }
 0x20e   : > { %774 = vmatprep.subr.bf16.mxu1 %v835_v0 }
 0x214   : > { %765 = vmatmul.mubr.msk.bf16.vlgmr.msra.gmra.mrb[8].mxu1 %vm167_vm1, %v398_v23 }
 0x215   : > { %775 = vmatpush3.bf16.xpose.msra.mxu1 %v524_v26  ;;  %776 = vmatprep.mubr.msk.bf16.mxu1 %vm836_vm0, %v835_v0 }
 0x21c   : > { %777 = vmatmul.mubr.msk.bf16.vlgmr.msra.gmra.mrb[12].mxu1 %vm167_vm1, %v517_v27 }
 0x2d7   : > { %v935_v30 = vpop.f32.mrb[0].mxu1 }
 0x2d8   : > { %v748_v31 = vpop.f32.mrb[1].mxu1 }
 0x2d9   : > { %v270_v32 = vpop.f32.mrb[2].mxu1 }
 0x2da   : > { %v749_v33 = vpop.f32.mrb[3].mxu1 }
 0x2df   : > { %v322_v34 = vpop.f32.mrb[4].mxu1 }
 0x2e0   : > { %v323_v35 = vadd.f32 %v907_v5, %v322_v34  ;;  %v754_v36 = vpop.f32.mrb[5].mxu1 }
 0x2e1   : > { %v325_v37 = vpop.f32.mrb[6].mxu1 }
 0x2e2   : > { %v755_v38 = vpop.f32.mrb[7].mxu1  ;;  %v328_v39 = vsel %vm167_vm1, %v323_v35, -inf }
 0x2e3   : > { %329 = vmax.xlane.f32.xlu1 %v328_v39 }
 0x2e7   : > { %v441_v40 = vpop.f32.mrb[8].mxu1 }
 0x2e8   : > { %v442_v41 = vadd.f32 %v907_v5, %v441_v40  ;;  %v766_v42 = vpop.f32.mrb[9].mxu1 }
 0x2e9   : > { %v444_v43 = vpop.f32.mrb[10].mxu1 }
 0x2ea   : > { %v767_v44 = vpop.f32.mrb[11].mxu1  ;;  %v447_v45 = vsel %vm167_vm1, %v442_v41, -inf }
 0x2eb   : > { %448 = vmax.xlane.f32.xlu0 %v447_v45 }
 0x2ef   : > { %v560_v46 = vpop.f32.mrb[12].mxu1 }
 0x2f0   : > { %v561_v47 = vadd.f32 %v907_v5, %v560_v46  ;;  %v778_v48 = vpop.f32.mrb[13].mxu1 }
 0x2f1   : > { %v563_v49 = vpop.f32.mrb[14].mxu1 }
 0x2f2   : > { %v779_v50 = vpop.f32.mrb[15].mxu1  ;;  %v566_v51 = vsel %vm167_vm1, %v561_v47, -inf }
 0x2f3   : > { %567 = vmax.xlane.f32.xlu0 %v566_v51 }
 0x2f4   : > { %457 = vrot.lane.b32.xlu1 %v888_v2, %s846_s27 }
 0x309   : > { %576 = vrot.lane.b32.xlu0 %v888_v2, %s847_s28 }
 0x370   : > { %v330_v52 = vpop.xlane.xlu1 %329 }
 0x371   : > { %v331_v53 = vsub.f32 %v323_v35, %v330_v52 }
 0x373   : > { %v332_v54 = vmul.f32 1.442695, %v331_v53 }
 0x374   : > { %v458_v58 = vpop.permute.xlu1 %457 }
 0x375   : > { %813 = vpow2.f32 %v332_v54  ;;  %v463_v60 = vsel %vm229_vm2, %v458_v58, 0 }
 0x378   : > { %v449_v55 = vpop.xlane.xlu0 %448 }
 0x379   : > { %v450_v56 = vsub.f32 %v442_v41, %v449_v55 }
 0x37b   : > { %v451_v57 = vmul.f32 1.442695, %v450_v56 }
 0x37d   : > { %815 = vpow2.f32 %v451_v57 }
 0x37f   : > { %v814_v59 = vpop.eup %813 }
 0x380   : > { %v568_v61 = vpop.xlane.xlu0 %567  ;;  %v334_v62 = vsel %vm167_vm1, %v814_v59, 0.0  ;;  %v337_v63 = vpack.c.bf16 %v814_v59, %v814_v59 }
 0x381   : > { %v569_v1 = vsub.f32 %v561_v47, %v568_v61  ;;  %335 = vadd.xlane.f32.xlu0 %v334_v62 }
 0x382   : > { %759 = vmatmul.mubr.msk.bf16.vlgmr.msra.gmra.mrb[4].mxu0 %vm167_vm1, %v337_v63 }
 0x383   : > { %v570_v2 = vmul.f32 1.442695, %v569_v1  ;;  %769 = vmatpush3.bf16.msra.mxu0 %v463_v60  ;;  %770 = vmatprep.mubr.msk.bf16.mxu0 %vm836_vm0, %v835_v0 }
 0x384   : > { %780 = vmatprep.subr.bf16.mxu0 %v835_v0  ;;  %v577_v3 = vpop.permute.xlu0 %576 }
 0x385   : > { %817 = vpow2.f32 %v570_v2  ;;  %v582_v5 = vsel %vm229_vm2, %v577_v3, 0 }
 0x387   : > { %v816_v4 = vpop.eup %815 }
 0x388   : > { %v453_v6 = vsel %vm167_vm1, %v816_v4, 0.0  ;;  %v456_v7 = vpack.c.bf16 %v816_v4, %v816_v4 }
 0x389   : > { %454 = vadd.xlane.f32.xlu1 %v453_v6 }
 0x38a   : > { %771 = vmatmul.mubr.msk.bf16.vlgmr.msra.gmra.mrb[8].mxu0 %vm167_vm1, %v456_v7 }
 0x38b   : > { %781 = vmatpush3.bf16.msra.mxu0 %v582_v5  ;;  %782 = vmatprep.mubr.msk.bf16.mxu0 %vm836_vm0, %v835_v0 }
 0x38f   : > { %v818_v8 = vpop.eup %817 }
 0x390   : > { %v572_v9 = vsel %vm167_vm1, %v818_v8, 0.0  ;;  %v575_v10 = vpack.c.bf16 %v818_v8, %v818_v8 }
 0x391   : > { %573 = vadd.xlane.f32.xlu0 %v572_v9 }
 0x392   : > { %783 = vmatmul.mubr.msk.bf16.vlgmr.msra.gmra.mrb[12].mxu0 %vm167_vm1, %v575_v10 }
 0x395   : > { %221 = vadd.xlane.f32.xlu0 %v220_v11 }
 0x40e   : > { %v336_v12 = vpop.xlane.xlu0 %335 }
 0x416   : > { %v455_v17 = vpop.xlane.xlu1 %454 }
 0x41e   : > { %v574_v13 = vpop.xlane.xlu0 %573 }
 0x422   : > { %v222_v14 = vpop.xlane.xlu0 %221 }
 0x423   : > { %819 = vrcp.f32 %v222_v14 }
 0x424   : > { %821 = vrcp.f32 %v336_v12 }
 0x425   : > { %823 = vrcp.f32 %v455_v17 }
 0x426   : > { %825 = vrcp.f32 %v574_v13 }
 0x42d   : > { %v820_v15 = vpop.eup %819 }
 0x42e   : > { %v274_v16 = vmul.f32 %v820_v15, %v935_v30  ;;  %v822_v18 = vpop.eup %821 }
 0x42f   : > { %v824_v25 = vpop.eup %823 }
 0x430   : > { %v275_v0 = vpack.c.bf16 %v274_v16, %v274_v16  ;;  %v826_v32 = vpop.eup %825 }
 0x432   : > { %277 = vst.msk [vmem:[%s966_s3] sm:$0xf] %vm276_vm3, %v275_v0 }
 0x455   : > { %v380_v19 = vpop.f32.mrb[4].mxu0 }
 0x456   : > { %v387_v20 = vmul.f32 %v822_v18, %v380_v19  ;;  %v760_v21 = vpop.f32.mrb[5].mxu0 }
 0x457   : > { %v383_v22 = vpop.f32.mrb[6].mxu0 }
 0x458   : > { %v719_v23 = vpack.c.bf16 %v387_v20, %v387_v20  ;;  %v761_v24 = vpop.f32.mrb[7].mxu0 }
 0x45a   : > { %392 = vrot.lane.b32.xlu0 %v719_v23, %s848_s4 }
 0x45d   : > { %v499_v26 = vpop.f32.mrb[8].mxu0 }
 0x45e   : > { %v506_v27 = vmul.f32 %v824_v25, %v499_v26  ;;  %v772_v28 = vpop.f32.mrb[9].mxu0 }
 0x45f   : > { %v502_v29 = vpop.f32.mrb[10].mxu0 }
 0x460   : > { %v720_v30 = vpack.c.bf16 %v506_v27, %v506_v27  ;;  %v773_v31 = vpop.f32.mrb[11].mxu0 }
 0x462   : > { %511 = vrot.lane.b32.xlu1 %v720_v30, %s849_s5 }
 0x465   : > { %v618_v33 = vpop.f32.mrb[12].mxu0 }
 0x466   : > { %v625_v34 = vmul.f32 %v826_v32, %v618_v33  ;;  %v784_v35 = vpop.f32.mrb[13].mxu0 }
 0x467   : > { %v621_v36 = vpop.f32.mrb[14].mxu0 }
 0x468   : > { %v721_v37 = vpack.c.bf16 %v625_v34, %v625_v34  ;;  %v785_v38 = vpop.f32.mrb[15].mxu0 }
 0x46a   : > { %630 = vrot.lane.b32.xlu0 %v721_v37, %s850_s6 }
 0x4cc   : > { %v393_v39 = vpop.permute.xlu0 %392 }
 0x4cd   : > { %396 = vst.msk [vmem:[%s966_s3] sm:$0xf] %vm395_vm4, %v393_v39 }
 0x4d4   : > { %v512_v40 = vpop.permute.xlu1 %511 }
 0x4d5   : > { %515 = vst.msk [vmem:[%s966_s3] sm:$0xf] %vm514_vm5, %v512_v40 }
 0x4dc   : > { %v631_v41 = vpop.permute.xlu0 %630 }
 0x4dd   : > { %634 = vst.msk [vmem:[%s966_s3] sm:$0xf] %vm633_vm6, %v631_v41 }
 0x4de PF: > { %s12_s9 = sadd.s32 1, %s833_s9  }
 0x4df   : > { %p9_p4 = scmp.ge.s32.totalorder %s12_s9, 4  }
 0x4e1   :  { %11 = sbr.rel (!%p9_p4) target bundleno = 1 (0x1), region = 61 }

// kernel: forward.13
= control target key start
LH: loop header
LB: loop body
LE: loop exit
PB: predicated region body
PF: predicated region fallthrough
CT: control target
= control target key end

     0   :  { %vm34_vm0 = vcmask 261120   ;;  %v360_v0 = vmov 0.0   ;;  %vm361_vm1 = vmmov 0   ;;  %vm165_vm2 = vcmask 523264   ;;  %s458_s1 = inlined_call_operand.vmem [shape: bf16[32,64], index: 1, kind: input, shape index: {}]   ;;  %s459_s0 = inlined_call_operand.vmem [shape: bf16[16,32], index: 0, kind: input, shape index: {}, may-alias: {0,5}]   ;;  %s460_s3 = inlined_call_operand.vmem [shape: bf16[64,32], index: 3, kind: input, shape index: {}]   ;;  %s461_s2 = inlined_call_operand.vmem [shape: f32[1,64], index: 2, kind: input, shape index: {}]   ;;  %s462_s5 = inlined_call_operand.vmem [shape: bf16[16,32], index: 5, kind: input, shape index: {}, may-alias: {0,5}]   ;;  %s463_s4 = inlined_call_operand.vmem [shape: f32[1,32], index: 4, kind: input, shape index: {}]   ;;  %s464_s6 = inlined_call_operand.vmem [shape: f32[1,32], index: 6, kind: input, shape index: {}]   ;;  %s465_s7 = inlined_call_operand.vmem [shape: f32[1,32], index: 7, kind: input, shape index: {}]   ;;  %s466_s8 = inlined_call_operand.vmem [shape: bf16[16,32], index: 8, kind: output, shape index: {}]  }
   0x1   :  { %323 = vmatprep.subr.bf16.mxu0 %v360_v0  ;;  %v345_v1 = vld [vmem:[%s458_s1] sm:$0xff]   ;;  %327 = vmatprep.mubr.msk.bf16.mxu0 %vm361_vm1, %v360_v0  ;;  %35 = vst.msk [vmem:[#allocation2] sm:$0xff] %vm34_vm0, %v360_v0  ;;  %36 = vst.msk [vmem:[#allocation2 + $0x8] sm:$0xff] %vm34_vm0, %v360_v0  ;;  %v346_v2 = vld [vmem:[%s458_s1 + $0x8] sm:$0xff]   ;;  %vm287_vm3 = vcmask 257024  }
   0x2   :  { %331 = vmatprep.subr.bf16.mxu1 %v360_v0  ;;  %339 = vmatprep.mubr.msk.bf16.mxu1 %vm361_vm1, %v360_v0  ;;  %v347_v3 = vld [vmem:[%s459_s0] sm:$0xff]   ;;  %v349_v5 = vld [vmem:[%s460_s3 + $0x8] sm:$0xff]   ;;  %v350_v6 = vld [vmem:[%s460_s3 + $0x10] sm:$0xff]  }
   0x3   :  { %324 = vmatpush3.bf16.msra.mxu0 %v345_v1  ;;  %v348_v4 = vld [vmem:[%s460_s3] sm:$0xff]   ;;  %v351_v7 = vld [vmem:[%s460_s3 + $0x18] sm:$0xff]  }
   0x4   :  { %325 = vmatprep.subr.bf16.mxu0 %v360_v0  ;;  %332 = vmatpush3.bf16.msra.mxu1 %v348_v4  ;;  %v294_v8 = vld [vmem:[%s461_s2] ss:$0 sm:$0xff] }
   0x5   :  { %333 = vmatprep.subr.bf16.mxu1 %v360_v0  ;;  %v312_v42 = vld [vmem:[%s462_s5] sm:$0xff]  }
   0x6   :  { %v304_v43 = vld [vmem:[%s463_s4] ss:$0 sm:$0xff]  ;;  %v313_v44 = vunpack.c.l.bf16 %v312_v42  ;;  %v314_v47 = vunpack.c.h.bf16 %v312_v42 }
   0x7   :  { %326 = vmatpush3.bf16.msra.mxu0 %v346_v2 }
   0x8   :  { %334 = vmatpush3.bf16.msra.mxu1 %v349_v5  ;;  %v130_v34 = vld [vmem:[#allocation2] sm:$0xff]  ;;  %v131_v36 = vld [vmem:[#allocation2 + $0x8] sm:$0xff] }
   0x9   :  { %335 = vmatprep.subr.bf16.mxu1 %v360_v0 }
   0xa   :  { %328 = vmatmul.mubr.msk.bf16.vlgmr.msra.gmra.mrb[0].mxu0 %vm34_vm0, %v347_v3 }
   0xc   :  { %336 = vmatpush3.bf16.msra.mxu1 %v350_v6 }
   0xd   :  { %337 = vmatprep.subr.bf16.mxu1 %v360_v0 }
  0x10   :  { %338 = vmatpush3.bf16.msra.mxu1 %v351_v7  ;;  %v305_v7 = vld [vmem:[%s464_s6] ss:$0 sm:$0xff] }
  0xdd   :  { %v105_v9 = vpop.f32.mrb[0].mxu0 }
  0xde   :  { %v106_v10 = vadd.f32 %v294_v8, %v105_v9  ;;  %v329_v11 = vpop.f32.mrb[1].mxu0  ;;  %v306_v9 = vld [vmem:[%s465_s7] ss:$0 sm:$0xff] }
  0xdf   :  { %v108_v12 = vpop.f32.mrb[2].mxu0 }
  0xe0   :  { %v114_v13 = vmul.f32 0.044715, %v106_v10  ;;  %v109_v14 = vadd.f32 %v294_v8, %v108_v12  ;;  %v330_v15 = vpop.f32.mrb[3].mxu0  ;;  %v112_v28 = vmul.f32 0.5, %v106_v10 }
  0xe2   :  { %v116_v16 = vmul.f32 %v114_v13, %v106_v10  ;;  %v115_v17 = vmul.f32 0.044715, %v109_v14  ;;  %v113_v29 = vmul.f32 0.5, %v109_v14 }
  0xe4   :  { %v118_v18 = vmul.f32 %v116_v16, %v106_v10  ;;  %v117_v19 = vmul.f32 %v115_v17, %v109_v14 }
  0xe6   :  { %v120_v20 = vadd.f32 %v118_v18, %v106_v10  ;;  %v119_v21 = vmul.f32 %v117_v19, %v109_v14 }
  0xe8   :  { %v122_v22 = vmul.f32 0.7978846, %v120_v20  ;;  %v121_v23 = vadd.f32 %v119_v21, %v109_v14 }
  0xea   :  { %352 = vtanh.f32 %v122_v22  ;;  %v123_v24 = vmul.f32 0.7978846, %v121_v23 }
  0xec   :  { %354 = vtanh.f32 %v123_v24 }
  0xf4   :  { %v353_v25 = vpop.eup %352 }
  0xf5   :  { %v126_v26 = vadd.f32 1.0, %v353_v25 }
  0xf6   :  { %v355_v27 = vpop.eup %354 }
  0xf7   :  { %v127_v30 = vadd.f32 1.0, %v355_v27  ;;  %v128_v31 = vmul.f32 %v126_v26, %v112_v28 }
  0xf9   :  { %v129_v32 = vmul.f32 %v127_v30, %v113_v29 }
  0xfb   :  { %v132_v33 = vpack.c.bf16 %v129_v32, %v128_v31 }
  0xfd   :  { %340 = vmatmul.mubr.msk.bf16.vlgmr.msra.gmra.mrb[0].mxu1 %vm165_vm2, %v132_v33 }
 0x1d0   :  { %v203_v35 = vpop.f32.mrb[0].mxu1 }
 0x1d1   :  { %v210_v37 = vadd.f32 %v203_v35, %v130_v34  ;;  %v341_v38 = vpop.f32.mrb[1].mxu1 }
 0x1d2   :  { %v206_v39 = vpop.f32.mrb[2].mxu1 }
 0x1d3   :  { %212 = vst.msk [vmem:[#allocation2] sm:$0xff] %vm34_vm0, %v210_v37  ;;  %v211_v40 = vadd.f32 %v206_v39, %v131_v36  ;;  %v342_v41 = vpop.f32.mrb[3].mxu1 }
 0x1d5   :  { %213 = vst.msk [vmem:[#allocation2 + $0x8] sm:$0xff] %vm34_vm0, %v211_v40 }
 0x1da   :  { %v217_v45 = vld [vmem:[#allocation2] sm:$0xff] }
 0x1db   :  { %v226_v46 = vadd.f32 %v304_v43, %v217_v45 }
 0x1dc   :  { %v218_v48 = vld [vmem:[#allocation2 + $0x8] sm:$0xff] }
 0x1dd   :  { %v232_v49 = vadd.f32 %v313_v44, %v226_v46  ;;  %v227_v50 = vadd.f32 %v304_v43, %v218_v48 }
 0x1df   :  { %v234_v51 = vsel %vm34_vm0, %v232_v49, 0.0  ;;  %v233_v52 = vadd.f32 %v314_v47, %v227_v50 }
 0x1e0   :  { %235 = vadd.xlane.f32.xlu0 %v234_v51 }
 0x1e1   :  { %v237_v53 = vsel %vm34_vm0, %v233_v52, 0.0 }
 0x1e4   :  { %238 = vadd.xlane.f32.xlu0 %v237_v53 }
 0x26d   :  { %v236_v54 = vpop.xlane.xlu0 %235 }
 0x26e   :  { %v241_v55 = vmul.f32 0.03125, %v236_v54 }
 0x270   :  { %v243_v56 = vsub.f32 %v232_v49, %v241_v55 }
 0x271   :  { %v239_v57 = vpop.xlane.xlu0 %238 }
 0x272   :  { %v242_v58 = vmul.f32 0.03125, %v239_v57  ;;  %v245_v59 = vmul.f32 %v243_v56, %v243_v56 }
 0x274   :  { %v244_v60 = vsub.f32 %v233_v52, %v242_v58  ;;  %v247_v61 = vsel %vm34_vm0, %v245_v59, 0.0 }
 0x275   :  { %248 = vadd.xlane.f32.xlu1 %v247_v61 }
 0x276   :  { %v246_v62 = vmul.f32 %v244_v60, %v244_v60 }
 0x278   :  { %v250_v63 = vsel %vm34_vm0, %v246_v62, 0.0 }
 0x279   :  { %251 = vadd.xlane.f32.xlu1 %v250_v63 }
 0x302   :  { %v249_v0 = vpop.xlane.xlu1 %248 }
 0x303   :  { %v253_v1 = vmul.f32 0.03125, %v249_v0 }
 0x305   :  { %v255_v2 = vadd.f32 1e-12, %v253_v1 }
 0x306   :  { %v252_v3 = vpop.xlane.xlu1 %251 }
 0x307   :  { %356 = vrsqrt.f32 %v255_v2  ;;  %v254_v4 = vmul.f32 0.03125, %v252_v3 }
 0x309   :  { %v256_v5 = vadd.f32 1e-12, %v254_v4 }
 0x30b   :  { %358 = vrsqrt.f32 %v256_v5 }
 0x311   :  { %v357_v6 = vpop.eup %356 }
 0x312   :  { %v259_v8 = vmul.f32 %v357_v6, %v243_v56 }
 0x314   :  { %v268_v10 = vmul.f32 %v305_v7, %v259_v8 }
 0x315   :  { %v359_v11 = vpop.eup %358 }
 0x316   :  { %v277_v12 = vadd.f32 %v306_v9, %v268_v10  ;;  %v260_v13 = vmul.f32 %v359_v11, %v244_v60 }
 0x318   :  { %v309_v14 = vpack.c.bf16 %v277_v12, %v277_v12  ;;  %v269_v15 = vmul.f32 %v305_v7, %v260_v13 }
 0x31a   :  { %288 = vst.msk [vmem:[%s466_s8] sm:$0xf] %vm287_vm3, %v309_v14  ;;  %v278_v16 = vadd.f32 %v306_v9, %v269_v15 }
 0x31c   :  { %v310_v17 = vpack.c.bf16 %v278_v16, %v278_v16 }
 0x31e   :  { %289 = vst.msk [vmem:[%s466_s8 + $0x4] sm:$0xf] %vm287_vm3, %v310_v17 }

</bundles_post_ra>
